<compile_context>
chip_gen: v7x
topology: tpu7x:2x2x1
jax: 0.10.0
libtpu: 0.0.40
codegen_flags: <defaults>
</compile_context>

<pallas_src>
import numpy as np
import jax
import jax.numpy as jnp
from jax.experimental import pallas as pl
from jax.experimental.pallas import tpu as pltpu

_MXU_DTYPE = jnp.bfloat16       # matmul operand / HBM activation dtype


# ---------------------------------------------------------------------------
# Banded ("fold kw into the contraction dim") conv-weight packing (trace-time).
# ---------------------------------------------------------------------------
def _band_selector(w_out, w_src, upsample):
    """sel[q, w, kw] = 1 iff source column q feeds output column w via tap kw
    (3x3 conv, pad=1; optionally with a folded 2x nearest W-upsample)."""
    q = np.arange(w_src)[:, None, None]          # source column
    wc = np.arange(w_out)[None, :, None]         # output column
    kw = np.arange(3)[None, None, :]             # conv tap
    col = wc + kw - 1                            # (upsampled,) padded input col
    if upsample:
        sel = (col >= 0) & (col < w_out) & ((col // 2) == q)
    else:
        sel = (col == q)
    return sel.astype(np.float32)


def _banded_weight(w_hwio, w_out, w_src, upsample):
    """(3,3,Cin,Cout) conv weight -> (3, w_src*Cin, w_out*Cout) so a 3x3 pad=1
    conv on row-packed activations X[h, q*Cin+c] becomes 3 banded matmuls."""
    cin, cout = w_hwio.shape[2], w_hwio.shape[3]
    sel = jnp.asarray(_band_selector(w_out, w_src, upsample), w_hwio.dtype)
    wb = jnp.einsum("qwk,hkcd->hqcwd", sel, w_hwio)   # (3, w_src, cin, w_out, cout)
    return wb.reshape(3, w_src * cin, w_out * cout)


def _fold_kh(wb):
    """(3, K, N) -> (3*K, N) bf16: kh taps folded into the contraction dim, so
    the conv becomes ONE matmul against the kh-folded operand."""
    return wb.reshape(wb.shape[0] * wb.shape[1], wb.shape[2]).astype(_MXU_DTYPE)


# ---------------------------------------------------------------------------
# In-kernel value-level helpers (no scratch, no per-row stores)
# ---------------------------------------------------------------------------
def _dup_rows_x2(x):
    """Nearest 2x upsample along rows, value-level (concat of static row
    slices; only used at tiny static row counts)."""
    parts = []
    for r in range(x.shape[0]):
        row = x[r:r + 1, :]
        parts.append(row)
        parts.append(row)
    return jnp.concatenate(parts, axis=0)


def _folded_taps(x2d, h):
    """Zero row-pad (pad=1) and fold the 3 kh taps into the lane/contraction
    dim: (h, K) -> (h, 3*K)."""
    k = x2d.shape[1]
    zero = jnp.zeros((1, k), x2d.dtype)
    xp = jnp.concatenate([zero, x2d, zero], axis=0)            # (h+2, K)
    return jnp.concatenate([xp[0:h], xp[1:h + 1], xp[2:h + 2]], axis=1)


def _make_decoder_kernel(plan, bt):
    """Fused whole-decoder kernel for a static per-block plan and batch tile."""
    n_blocks = len(plan)

    def kernel(*refs):
        # ---------------- unpack refs (inputs then outputs) ------------------
        idx = 0
        head_ref = refs[idx]; idx += 1
        skip_refs = {}
        for i, p in enumerate(plan):
            if p["has_skip"]:
                skip_refs[i] = refs[idx]; idx += 1
        w_refs = []
        for _ in plan:
            w_refs.append({"wf1": refs[idx], "b1": refs[idx + 1],
                           "wf2": refs[idx + 2], "b2": refs[idx + 3]})
            idx += 4
        out_refs = list(refs[idx:idx + n_blocks]); idx += n_blocks
        assert idx == len(refs)

        # ------------------------------ compute ------------------------------
        # per-image activations, kept in f32 between convs (operands are cast
        # to bf16 exactly once, right at the MXU matmul).
        xs = [head_ref[b, :, :].astype(jnp.float32) for b in range(bt)]
        for i, p in enumerate(plan):
            h = p["H"]
            # conv1: upsample + skip-concat + 3x3 pad folded into ONE operand
            # of shape (bt*H, 3*(Kx+Ks)) -> ONE bf16 MXU matmul.
            ops = []
            for b in range(bt):
                xb = xs[b]
                if p["up"]:
                    xb = _dup_rows_x2(xb)                      # nearest 2x in H
                if p["has_skip"]:
                    sk = skip_refs[i][b, :, :].astype(jnp.float32)
                    xb = jnp.concatenate([xb, sk], axis=1)     # torch.cat([x,skip],1)
                ops.append(_folded_taps(xb, h))
            op1 = ops[0] if bt == 1 else jnp.concatenate(ops, axis=0)
            y1 = jnp.dot(op1.astype(_MXU_DTYPE), w_refs[i]["wf1"][...],
                         preferred_element_type=jnp.float32)
            y1 = jnp.maximum(y1 + w_refs[i]["b1"][...], 0.0)   # BN bias + ReLU

            # conv2: again ONE matmul on the kh-folded operand (stays in VMEM).
            ops2 = [_folded_taps(y1[b * h:(b + 1) * h, :], h) for b in range(bt)]
            op2 = ops2[0] if bt == 1 else jnp.concatenate(ops2, axis=0)
            y2 = jnp.dot(op2.astype(_MXU_DTYPE), w_refs[i]["wf2"][...],
                         preferred_element_type=jnp.float32)
            y2 = jnp.maximum(y2 + w_refs[i]["b2"][...], 0.0)

            nxt = []
            for b in range(bt):
                y2b = y2[b * h:(b + 1) * h, :]
                out_refs[i][b, :, :] = y2b.astype(out_refs[i].dtype)  # bf16 out
                nxt.append(y2b)
            xs = nxt                                           # feeds block i+1

    return kernel


# ---------------------------------------------------------------------------
# Layout glue (plain JAX, boundary only)
# ---------------------------------------------------------------------------
def _nchw_to_packed(x):
    b, c, h, w = x.shape
    return jnp.transpose(x, (0, 2, 3, 1)).reshape(b, h, w * c).astype(_MXU_DTYPE)


def _maxpool2x2_nchw(x):
    b, c, h, w = x.shape
    return x.reshape(b, c, h // 2, 2, w // 2, 2).max(axis=(3, 5))


def _upsample2x_nhwc(x):
    return jnp.repeat(jnp.repeat(x, 2, axis=1), 2, axis=2)


# ---------------------------------------------------------------------------
# Deterministic parameter construction (BN scale folded into conv weights)
# ---------------------------------------------------------------------------
def _init_conv_bn_relu(key, cin, cout):
    kw_, kg, kb = jax.random.split(key, 3)
    w = 0.1 * jax.random.normal(kw_, (3, 3, cin, cout), jnp.float32)
    gamma = 1.0 + 0.1 * jax.random.normal(kg, (cout,), jnp.float32)
    beta = 0.1 * jax.random.normal(kb, (cout,), jnp.float32)
    running_mean = jnp.zeros((cout,), jnp.float32)
    running_var = jnp.ones((cout,), jnp.float32)
    eps = 1e-5
    scale = gamma / jnp.sqrt(running_var + eps)
    bias = beta - running_mean * scale
    # TODO(synk): training-mode BatchNorm (batch statistics) is not modelled.
    return {"w": w * scale[None, None, None, :], "bias": bias}


# ---------------------------------------------------------------------------
# CustomUnetDecoder port
# ---------------------------------------------------------------------------
class CustomUnetDecoderPallas:
    def __init__(self, key, encoder_channels, decoder_channels,
                 use_batchnorm=True, attention_type=None, center=False):
        assert attention_type is None        # md.Attention(None) == Identity
        assert not center                    # nn.Identity center
        n_blocks = len(decoder_channels)
        enc = list(encoder_channels[:n_blocks + 1])[1:][::-1]

        self.upsample_flags = [True] * n_blocks
        self.upsample_flags[-2:] = [False, False]
        self.num_downsample = [0] * n_blocks
        self.num_downsample[-2:] = [1, 2]

        head_channels = enc[0]
        self.in_channels = [head_channels] + list(decoder_channels[:-1])
        self.skip_channels = list(enc[1:]) + [0]
        self.out_channels = list(decoder_channels)
        self.n_blocks = n_blocks

        self.block_params = []
        keys = jax.random.split(key, n_blocks)
        for i in range(n_blocks):
            k1, k2 = jax.random.split(keys[i])
            c1 = _init_conv_bn_relu(
                k1, self.in_channels[i] + self.skip_channels[i],
                self.out_channels[i])
            c2 = _init_conv_bn_relu(k2, self.out_channels[i],
                                    self.out_channels[i])
            self.block_params.append((c1, c2))

        self._packed_cache = {}

    # packed (banded, skip-merged, kh-folded, BN-folded, bf16) weights
    def _pack_params(self, plan):
        packed = []
        for i, p in enumerate(plan):
            c1, c2 = self.block_params[i]
            w_out, cout, cx = p["W"], p["Cout"], p["Cx"]
            parts = [_banded_weight(c1["w"][:, :, :cx, :], w_out,
                                    p["Wx"] if p["up"] else w_out, p["up"])]
            if p["has_skip"]:
                parts.append(_banded_weight(c1["w"][:, :, cx:, :],
                                            w_out, w_out, False))
            wb1 = parts[0] if len(parts) == 1 else jnp.concatenate(parts, axis=1)
            packed.append({
                "wf1": _fold_kh(wb1),
                "b1": jnp.tile(c1["bias"], w_out).reshape(1, w_out * cout),
                "wf2": _fold_kh(_banded_weight(c2["w"], w_out, w_out, False)),
                "b2": jnp.tile(c2["bias"], w_out).reshape(1, w_out * cout),
            })
        return packed

    def __call__(self, *features_nchw):
        feats = list(features_nchw[1:])[::-1]
        B = feats[0].shape[0]
        skips_nchw = feats[1:]

        # ---------- static per-block plan + packed bf16 (B, H, W*C) inputs ---
        plan = []
        acts = [_nchw_to_packed(feats[0])]                    # head
        h, w = feats[0].shape[2], feats[0].shape[3]
        for i in range(self.n_blocks):
            up = self.upsample_flags[i]
            hx, wx = h, w
            if up:
                h, w = 2 * h, 2 * w
            has_skip = (i < len(skips_nchw)) and (self.skip_channels[i] > 0)
            plan.append(dict(up=up, has_skip=has_skip, Hx=hx, Wx=wx, H=h, W=w,
                             Cx=self.in_channels[i], Cs=self.skip_channels[i],
                             Cout=self.out_channels[i]))
            if has_skip:
                s = skips_nchw[i]
                for _ in range(self.num_downsample[i]):
                    s = _maxpool2x2_nchw(s)                   # nn.MaxPool2d(2)
                assert s.shape[2] == h and s.shape[3] == w
                acts.append(_nchw_to_packed(s))

        cache_key = tuple((p["H"], p["W"]) for p in plan)
        if cache_key not in self._packed_cache:
            self._packed_cache[cache_key] = self._pack_params(plan)
        packed = self._packed_cache[cache_key]

        # batch tiling: 2 "parallel" grid steps when possible (both v7x TCs),
        # the rest of the batch folded into the matmul M dimension (M = bt*H).
        if B >= 2 and B % 2 == 0:
            grid_b, bt = 2, B // 2
        else:
            grid_b, bt = B, 1

        # --------------------------- pallas wiring ---------------------------
        def _batch_spec(shape3):
            return pl.BlockSpec((bt, shape3[1], shape3[2]), lambda b: (b, 0, 0))

        def _const_spec(shape):
            nd = len(shape)
            return pl.BlockSpec(tuple(shape), lambda *_: (0,) * nd)

        inputs, in_specs = [], []
        for a in acts:
            inputs.append(a)
            in_specs.append(_batch_spec(a.shape))
        for i in range(self.n_blocks):
            for name in ("wf1", "b1", "wf2", "b2"):
                arr = packed[i][name]
                inputs.append(arr)
                in_specs.append(_const_spec(arr.shape))

        out_shapes = tuple(
            jax.ShapeDtypeStruct((B, p["H"], p["W"] * p["Cout"]), _MXU_DTYPE)
            for p in plan)
        out_specs = tuple(
            pl.BlockSpec((bt, p["H"], p["W"] * p["Cout"]), lambda b: (b, 0, 0))
            for p in plan)

        # explicit VMEM budget (double-buffered inputs/outputs + margin),
        # capped below v7x's 64 MiB physical VMEM.
        def _nbytes(shape, dtype):
            return int(np.prod(shape)) * jnp.dtype(dtype).itemsize
        need = 2 * (sum(_nbytes(a.shape, a.dtype) for a in inputs)
                    + sum(_nbytes(s.shape, s.dtype) for s in out_shapes))
        need += 4 << 20
        vmem_limit = int(min(64 << 20, max(need, 32 << 20)))

        fms_packed = pl.pallas_call(
            _make_decoder_kernel(plan, bt),
            out_shape=out_shapes,
            grid_spec=pltpu.PrefetchScalarGridSpec(
                num_scalar_prefetch=0,
                grid=(grid_b,),
                in_specs=in_specs,
                out_specs=out_specs),
            compiler_params=pltpu.CompilerParams(
                dimension_semantics=("parallel",),
                vmem_limit_bytes=vmem_limit),
        )(*inputs)

        # -------- final upsample/concat stack (tiny bf16 XLA glue) + NCHW ----
        fms = [o.reshape(B, p["H"], p["W"], p["Cout"])
               for o, p in zip(fms_packed, plan)]
        x = fms[0]
        rest = fms[1:]
        for i in range(len(rest) - 2):
            x = jnp.concatenate([_upsample2x_nhwc(x), rest[i]], axis=-1)
        for i in range(2):
            x = jnp.concatenate([x, rest[-(i + 1)]], axis=-1)
        return jnp.transpose(x, (0, 3, 1, 2)).astype(jnp.float32)


# ---------------------------------------------------------------------------
# Plain-JAX f32 reference (same folded parameters) for a loose numeric check
# ---------------------------------------------------------------------------
def _conv_bn_relu_ref(x_nhwc, params):
    y = jax.lax.conv_general_dilated(
        x_nhwc, params["w"], window_strides=(1, 1), padding="SAME",
        dimension_numbers=("NHWC", "HWIO", "NHWC"))
    return jnp.maximum(y + params["bias"], 0.0)


def _reference_forward(dec, features_nchw):
    feats = [jnp.transpose(f, (0, 2, 3, 1)) for f in features_nchw]
    feats = feats[1:][::-1]
    x = feats[0]
    skips = feats[1:]
    fms = []
    for i in range(dec.n_blocks):
        skip = skips[i] if (i < len(skips) and dec.skip_channels[i] > 0) else None
        if skip is not None:
            for _ in range(dec.num_downsample[i]):
                b, hh, ww, c = skip.shape
                skip = skip.reshape(b, hh // 2, 2, ww // 2, 2, c).max(axis=(2, 4))
        if dec.upsample_flags[i]:
            x = _upsample2x_nhwc(x)
        if skip is not None:
            x = jnp.concatenate([x, skip], axis=-1)
        c1, c2 = dec.block_params[i]
        x = _conv_bn_relu_ref(x, c1)
        x = _conv_bn_relu_ref(x, c2)
        fms.append(x)
    x = fms[0]
    rest = fms[1:]
    for i in range(len(rest) - 2):
        x = jnp.concatenate([_upsample2x_nhwc(x), rest[i]], axis=-1)
    for i in range(2):
        x = jnp.concatenate([x, rest[-(i + 1)]], axis=-1)
    return jnp.transpose(x, (0, 3, 1, 2))


# ---------------------------------------------------------------------------
if __name__ == "__main__":
    key = jax.random.PRNGKey(0)
    kp, kf = jax.random.split(key)

    # Small synthetic UNet-style configuration (N = 4 decoder blocks).
    encoder_channels = (3, 8, 8, 16, 16)
    decoder_channels = (16, 16, 8, 8)
    B = 4  # even -> 2 parallel grid steps, bt=2 images folded into matmul M

    # Encoder feature pyramid (NCHW); features[0] is discarded by the decoder.
    fkeys = jax.random.split(kf, 5)
    features = [
        jax.random.normal(fkeys[0], (B, 3, 32, 32), jnp.float32),
        jax.random.normal(fkeys[1], (B, 8, 16, 16), jnp.float32),
        jax.random.normal(fkeys[2], (B, 8, 8, 8), jnp.float32),
        jax.random.normal(fkeys[3], (B, 16, 4, 4), jnp.float32),
        jax.random.normal(fkeys[4], (B, 16, 2, 2), jnp.float32),
    ]

    decoder = CustomUnetDecoderPallas(kp, encoder_channels, decoder_channels,
                                      use_batchnorm=True, attention_type=None,
                                      center=False)

    fwd = jax.jit(lambda *fs: decoder(*fs))
    out = jax.block_until_ready(fwd(*features))

    # Output channels = sum(decoder_channels) = 48, spatial = 8x8.
    assert out.shape == (B, sum(decoder_channels), 8, 8), out.shape
    assert bool(jnp.all(jnp.isfinite(out)))

    # Loose check vs a plain-JAX f32 reference (kernel uses bf16 MXU operands,
    # bf16 HBM activations/outputs, f32 accumulation).
    ref = _reference_forward(decoder, features)
    rel = float(jnp.linalg.norm(out - ref) / (jnp.linalg.norm(ref) + 1e-12))
    assert rel < 0.08, f"relative error vs reference too large: {rel}"

    print("KERNEL_OK")
</pallas_src>

<mosaic_0001>
module attributes {stable_mosaic.version = 11 : i64} {
  func.func @kernel(%arg0: i32, %arg1: memref<2x2x32xbf16, #tpu.memory_space<vmem>>, %arg2: memref<2x4x64xbf16, #tpu.memory_space<vmem>>, %arg3: memref<2x8x64xbf16, #tpu.memory_space<vmem>>, %arg4: memref<2x8x64xbf16, #tpu.memory_space<vmem>>, %arg5: memref<288x64xbf16, #tpu.memory_space<vmem>>, %arg6: memref<1x64xf32, #tpu.memory_space<vmem>>, %arg7: memref<192x64xbf16, #tpu.memory_space<vmem>>, %arg8: memref<1x64xf32, #tpu.memory_space<vmem>>, %arg9: memref<384x128xbf16, #tpu.memory_space<vmem>>, %arg10: memref<1x128xf32, #tpu.memory_space<vmem>>, %arg11: memref<384x128xbf16, #tpu.memory_space<vmem>>, %arg12: memref<1x128xf32, #tpu.memory_space<vmem>>, %arg13: memref<576x64xbf16, #tpu.memory_space<vmem>>, %arg14: memref<1x64xf32, #tpu.memory_space<vmem>>, %arg15: memref<192x64xbf16, #tpu.memory_space<vmem>>, %arg16: memref<1x64xf32, #tpu.memory_space<vmem>>, %arg17: memref<192x64xbf16, #tpu.memory_space<vmem>>, %arg18: memref<1x64xf32, #tpu.memory_space<vmem>>, %arg19: memref<192x64xbf16, #tpu.memory_space<vmem>>, %arg20: memref<1x64xf32, #tpu.memory_space<vmem>>, %arg21: memref<2x4x64xbf16, #tpu.memory_space<vmem>>, %arg22: memref<2x8x128xbf16, #tpu.memory_space<vmem>>, %arg23: memref<2x8x64xbf16, #tpu.memory_space<vmem>>, %arg24: memref<2x8x64xbf16, #tpu.memory_space<vmem>>) attributes {dimension_semantics = [#tpu.dimension_semantics<parallel>], iteration_bounds = array<i64: 2>, scalar_prefetch = 0 : i64, scratch_operands = 0 : i64, tpu.core_type = #tpu.core_type<tc>, window_params = [{transform_indices = @transform_0, window_bounds = array<i64: 2, 2, 32>}, {transform_indices = @transform_1, window_bounds = array<i64: 2, 4, 64>}, {transform_indices = @transform_2, window_bounds = array<i64: 2, 8, 64>}, {transform_indices = @transform_3, window_bounds = array<i64: 2, 8, 64>}, {pipeline_mode = #tpu.pipeline_mode<synchronous>, transform_indices = @transform_4, window_bounds = array<i64: 288, 64>}, {pipeline_mode = #tpu.pipeline_mode<synchronous>, transform_indices = @transform_5, window_bounds = array<i64: 1, 64>}, {pipeline_mode = #tpu.pipeline_mode<synchronous>, transform_indices = @transform_6, window_bounds = array<i64: 192, 64>}, {pipeline_mode = #tpu.pipeline_mode<synchronous>, transform_indices = @transform_7, window_bounds = array<i64: 1, 64>}, {pipeline_mode = #tpu.pipeline_mode<synchronous>, transform_indices = @transform_8, window_bounds = array<i64: 384, 128>}, {pipeline_mode = #tpu.pipeline_mode<synchronous>, transform_indices = @transform_9, window_bounds = array<i64: 1, 128>}, {pipeline_mode = #tpu.pipeline_mode<synchronous>, transform_indices = @transform_10, window_bounds = array<i64: 384, 128>}, {pipeline_mode = #tpu.pipeline_mode<synchronous>, transform_indices = @transform_11, window_bounds = array<i64: 1, 128>}, {pipeline_mode = #tpu.pipeline_mode<synchronous>, transform_indices = @transform_12, window_bounds = array<i64: 576, 64>}, {pipeline_mode = #tpu.pipeline_mode<synchronous>, transform_indices = @transform_13, window_bounds = array<i64: 1, 64>}, {pipeline_mode = #tpu.pipeline_mode<synchronous>, transform_indices = @transform_14, window_bounds = array<i64: 192, 64>}, {pipeline_mode = #tpu.pipeline_mode<synchronous>, transform_indices = @transform_15, window_bounds = array<i64: 1, 64>}, {pipeline_mode = #tpu.pipeline_mode<synchronous>, transform_indices = @transform_16, window_bounds = array<i64: 192, 64>}, {pipeline_mode = #tpu.pipeline_mode<synchronous>, transform_indices = @transform_17, window_bounds = array<i64: 1, 64>}, {pipeline_mode = #tpu.pipeline_mode<synchronous>, transform_indices = @transform_18, window_bounds = array<i64: 192, 64>}, {pipeline_mode = #tpu.pipeline_mode<synchronous>, transform_indices = @transform_19, window_bounds = array<i64: 1, 64>}, {transform_indices = @transform_20, window_bounds = array<i64: 2, 4, 64>}, {transform_indices = @transform_21, window_bounds = array<i64: 2, 8, 128>}, {transform_indices = @transform_22, window_bounds = array<i64: 2, 8, 64>}, {transform_indices = @transform_23, window_bounds = array<i64: 2, 8, 64>}]} {
    %c0 = arith.constant 0 : index
    %c0_0 = arith.constant 0 : index
    %c0_1 = arith.constant 0 : index
    %0 = vector.load %arg1[%c0, %c0_0, %c0_1] : memref<2x2x32xbf16, #tpu.memory_space<vmem>>, vector<1x2x32xbf16>
    %1 = vector.shape_cast %0 : vector<1x2x32xbf16> to vector<2x32xbf16>
    %2 = arith.extf %1 : vector<2x32xbf16> to vector<2x32xf32>
    %c1 = arith.constant 1 : index
    %c0_2 = arith.constant 0 : index
    %c0_3 = arith.constant 0 : index
    %3 = vector.load %arg1[%c1, %c0_2, %c0_3] : memref<2x2x32xbf16, #tpu.memory_space<vmem>>, vector<1x2x32xbf16>
    %4 = vector.shape_cast %3 : vector<1x2x32xbf16> to vector<2x32xbf16>
    %5 = arith.extf %4 : vector<2x32xbf16> to vector<2x32xf32>
    %6 = vector.extract_strided_slice %2 {offsets = [0, 0], sizes = [1, 32], strides = [1, 1]} : vector<2x32xf32> to vector<1x32xf32>
    %7 = vector.extract_strided_slice %2 {offsets = [1, 0], sizes = [1, 32], strides = [1, 1]} : vector<2x32xf32> to vector<1x32xf32>
    %8 = tpu.concatenate %6, %6, %7, %7 in 0 : vector<1x32xf32>, vector<1x32xf32>, vector<1x32xf32>, vector<1x32xf32> -> vector<4x32xf32>
    %c0_4 = arith.constant 0 : index
    %c0_5 = arith.constant 0 : index
    %c0_6 = arith.constant 0 : index
    %9 = vector.load %arg2[%c0_4, %c0_5, %c0_6] : memref<2x4x64xbf16, #tpu.memory_space<vmem>>, vector<1x4x64xbf16>
    %10 = vector.shape_cast %9 : vector<1x4x64xbf16> to vector<4x64xbf16>
    %11 = arith.extf %10 : vector<4x64xbf16> to vector<4x64xf32>
    %12 = tpu.concatenate %8, %11 in 1 : vector<4x32xf32>, vector<4x64xf32> -> vector<4x96xf32>
    %cst = arith.constant 0.000000e+00 : f32
    %13 = vector.broadcast %cst : f32 to vector<1x96xf32>
    %14 = tpu.concatenate %13, %12, %13 in 0 : vector<1x96xf32>, vector<4x96xf32>, vector<1x96xf32> -> vector<6x96xf32>
    %15 = vector.extract_strided_slice %14 {offsets = [0, 0], sizes = [4, 96], strides = [1, 1]} : vector<6x96xf32> to vector<4x96xf32>
    %16 = vector.extract_strided_slice %14 {offsets = [1, 0], sizes = [4, 96], strides = [1, 1]} : vector<6x96xf32> to vector<4x96xf32>
    %17 = vector.extract_strided_slice %14 {offsets = [2, 0], sizes = [4, 96], strides = [1, 1]} : vector<6x96xf32> to vector<4x96xf32>
    %18 = tpu.concatenate %15, %16, %17 in 1 : vector<4x96xf32>, vector<4x96xf32>, vector<4x96xf32> -> vector<4x288xf32>
    %19 = vector.extract_strided_slice %5 {offsets = [0, 0], sizes = [1, 32], strides = [1, 1]} : vector<2x32xf32> to vector<1x32xf32>
    %20 = vector.extract_strided_slice %5 {offsets = [1, 0], sizes = [1, 32], strides = [1, 1]} : vector<2x32xf32> to vector<1x32xf32>
    %21 = tpu.concatenate %19, %19, %20, %20 in 0 : vector<1x32xf32>, vector<1x32xf32>, vector<1x32xf32>, vector<1x32xf32> -> vector<4x32xf32>
    %c1_7 = arith.constant 1 : index
    %c0_8 = arith.constant 0 : index
    %c0_9 = arith.constant 0 : index
    %22 = vector.load %arg2[%c1_7, %c0_8, %c0_9] : memref<2x4x64xbf16, #tpu.memory_space<vmem>>, vector<1x4x64xbf16>
    %23 = vector.shape_cast %22 : vector<1x4x64xbf16> to vector<4x64xbf16>
    %24 = arith.extf %23 : vector<4x64xbf16> to vector<4x64xf32>
    %25 = tpu.concatenate %21, %24 in 1 : vector<4x32xf32>, vector<4x64xf32> -> vector<4x96xf32>
    %cst_10 = arith.constant 0.000000e+00 : f32
    %26 = vector.broadcast %cst_10 : f32 to vector<1x96xf32>
    %27 = tpu.concatenate %26, %25, %26 in 0 : vector<1x96xf32>, vector<4x96xf32>, vector<1x96xf32> -> vector<6x96xf32>
    %28 = vector.extract_strided_slice %27 {offsets = [0, 0], sizes = [4, 96], strides = [1, 1]} : vector<6x96xf32> to vector<4x96xf32>
    %29 = vector.extract_strided_slice %27 {offsets = [1, 0], sizes = [4, 96], strides = [1, 1]} : vector<6x96xf32> to vector<4x96xf32>
    %30 = vector.extract_strided_slice %27 {offsets = [2, 0], sizes = [4, 96], strides = [1, 1]} : vector<6x96xf32> to vector<4x96xf32>
    %31 = tpu.concatenate %28, %29, %30 in 1 : vector<4x96xf32>, vector<4x96xf32>, vector<4x96xf32> -> vector<4x288xf32>
    %32 = tpu.concatenate %18, %31 in 0 : vector<4x288xf32>, vector<4x288xf32> -> vector<8x288xf32>
    %33 = arith.truncf %32 : vector<8x288xf32> to vector<8x288xbf16>
    %c0_11 = arith.constant 0 : index
    %c0_12 = arith.constant 0 : index
    %34 = vector.load %arg5[%c0_11, %c0_12] : memref<288x64xbf16, #tpu.memory_space<vmem>>, vector<288x64xbf16>
    %cst_13 = arith.constant dense<0.000000e+00> : vector<8x64xf32>
    %35 = tpu.matmul %33, %34, %cst_13 {dimension_numbers = #tpu.dot_dimension_numbers<[1], [0], [0], [1], [0, 0, 1, 1], [], []>} : vector<8x288xbf16>, vector<288x64xbf16>, vector<8x64xf32> -> vector<8x64xf32>
    %c0_14 = arith.constant 0 : index
    %c0_15 = arith.constant 0 : index
    %36 = vector.load %arg6[%c0_14, %c0_15] : memref<1x64xf32, #tpu.memory_space<vmem>>, vector<1x64xf32>
    %37 = vector.broadcast %36 : vector<1x64xf32> to vector<8x64xf32>
    %38 = arith.addf %35, %37 : vector<8x64xf32>
    %cst_16 = arith.constant 0.000000e+00 : f32
    %39 = vector.broadcast %cst_16 : f32 to vector<8x64xf32>
    %40 = arith.maximumf %38, %39 : vector<8x64xf32>
    %41 = vector.extract_strided_slice %40 {offsets = [0, 0], sizes = [4, 64], strides = [1, 1]} : vector<8x64xf32> to vector<4x64xf32>
    %cst_17 = arith.constant 0.000000e+00 : f32
    %42 = vector.broadcast %cst_17 : f32 to vector<1x64xf32>
    %43 = tpu.concatenate %42, %41, %42 in 0 : vector<1x64xf32>, vector<4x64xf32>, vector<1x64xf32> -> vector<6x64xf32>
    %44 = vector.extract_strided_slice %43 {offsets = [0, 0], sizes = [4, 64], strides = [1, 1]} : vector<6x64xf32> to vector<4x64xf32>
    %45 = vector.extract_strided_slice %43 {offsets = [1, 0], sizes = [4, 64], strides = [1, 1]} : vector<6x64xf32> to vector<4x64xf32>
    %46 = vector.extract_strided_slice %43 {offsets = [2, 0], sizes = [4, 64], strides = [1, 1]} : vector<6x64xf32> to vector<4x64xf32>
    %47 = tpu.concatenate %44, %45, %46 in 1 : vector<4x64xf32>, vector<4x64xf32>, vector<4x64xf32> -> vector<4x192xf32>
    %48 = vector.extract_strided_slice %40 {offsets = [4, 0], sizes = [4, 64], strides = [1, 1]} : vector<8x64xf32> to vector<4x64xf32>
    %cst_18 = arith.constant 0.000000e+00 : f32
    %49 = vector.broadcast %cst_18 : f32 to vector<1x64xf32>
    %50 = tpu.concatenate %49, %48, %49 in 0 : vector<1x64xf32>, vector<4x64xf32>, vector<1x64xf32> -> vector<6x64xf32>
    %51 = vector.extract_strided_slice %50 {offsets = [0, 0], sizes = [4, 64], strides = [1, 1]} : vector<6x64xf32> to vector<4x64xf32>
    %52 = vector.extract_strided_slice %50 {offsets = [1, 0], sizes = [4, 64], strides = [1, 1]} : vector<6x64xf32> to vector<4x64xf32>
    %53 = vector.extract_strided_slice %50 {offsets = [2, 0], sizes = [4, 64], strides = [1, 1]} : vector<6x64xf32> to vector<4x64xf32>
    %54 = tpu.concatenate %51, %52, %53 in 1 : vector<4x64xf32>, vector<4x64xf32>, vector<4x64xf32> -> vector<4x192xf32>
    %55 = tpu.concatenate %47, %54 in 0 : vector<4x192xf32>, vector<4x192xf32> -> vector<8x192xf32>
    %56 = arith.truncf %55 : vector<8x192xf32> to vector<8x192xbf16>
    %c0_19 = arith.constant 0 : index
    %c0_20 = arith.constant 0 : index
    %57 = vector.load %arg7[%c0_19, %c0_20] : memref<192x64xbf16, #tpu.memory_space<vmem>>, vector<192x64xbf16>
    %cst_21 = arith.constant dense<0.000000e+00> : vector<8x64xf32>
    %58 = tpu.matmul %56, %57, %cst_21 {dimension_numbers = #tpu.dot_dimension_numbers<[1], [0], [0], [1], [0, 0, 1, 1], [], []>} : vector<8x192xbf16>, vector<192x64xbf16>, vector<8x64xf32> -> vector<8x64xf32>
    %c0_22 = arith.constant 0 : index
    %c0_23 = arith.constant 0 : index
    %59 = vector.load %arg8[%c0_22, %c0_23] : memref<1x64xf32, #tpu.memory_space<vmem>>, vector<1x64xf32>
    %60 = vector.broadcast %59 : vector<1x64xf32> to vector<8x64xf32>
    %61 = arith.addf %58, %60 : vector<8x64xf32>
    %cst_24 = arith.constant 0.000000e+00 : f32
    %62 = vector.broadcast %cst_24 : f32 to vector<8x64xf32>
    %63 = arith.maximumf %61, %62 : vector<8x64xf32>
    %64 = vector.extract_strided_slice %63 {offsets = [0, 0], sizes = [4, 64], strides = [1, 1]} : vector<8x64xf32> to vector<4x64xf32>
    %65 = arith.truncf %64 : vector<4x64xf32> to vector<4x64xbf16>
    %c0_25 = arith.constant 0 : index
    %c0_26 = arith.constant 0 : index
    %c0_27 = arith.constant 0 : index
    %66 = vector.load %arg21[%c0_25, %c0_26, %c0_27] : memref<2x4x64xbf16, #tpu.memory_space<vmem>>, vector<1x4x64xbf16>
    %67 = vector.shape_cast %66 : vector<1x4x64xbf16> to vector<4x64xbf16>
    %68 = vector.shape_cast %65 : vector<4x64xbf16> to vector<1x4x64xbf16>
    tpu.vector_store %arg21[%c0_25, %c0_26, %c0_27], %68 {strides = array<i32>} : memref<2x4x64xbf16, #tpu.memory_space<vmem>>, vector<1x4x64xbf16>,
    %69 = vector.extract_strided_slice %63 {offsets = [4, 0], sizes = [4, 64], strides = [1, 1]} : vector<8x64xf32> to vector<4x64xf32>
    %70 = arith.truncf %69 : vector<4x64xf32> to vector<4x64xbf16>
    %c1_28 = arith.constant 1 : index
    %c0_29 = arith.constant 0 : index
    %c0_30 = arith.constant 0 : index
    %71 = vector.load %arg21[%c1_28, %c0_29, %c0_30] : memref<2x4x64xbf16, #tpu.memory_space<vmem>>, vector<1x4x64xbf16>
    %72 = vector.shape_cast %71 : vector<1x4x64xbf16> to vector<4x64xbf16>
    %73 = vector.shape_cast %70 : vector<4x64xbf16> to vector<1x4x64xbf16>
    tpu.vector_store %arg21[%c1_28, %c0_29, %c0_30], %73 {strides = array<i32>} : memref<2x4x64xbf16, #tpu.memory_space<vmem>>, vector<1x4x64xbf16>,
    %74 = vector.extract_strided_slice %64 {offsets = [0, 0], sizes = [1, 64], strides = [1, 1]} : vector<4x64xf32> to vector<1x64xf32>
    %75 = vector.extract_strided_slice %64 {offsets = [1, 0], sizes = [1, 64], strides = [1, 1]} : vector<4x64xf32> to vector<1x64xf32>
    %76 = vector.extract_strided_slice %64 {offsets = [2, 0], sizes = [1, 64], strides = [1, 1]} : vector<4x64xf32> to vector<1x64xf32>
    %77 = vector.extract_strided_slice %64 {offsets = [3, 0], sizes = [1, 64], strides = [1, 1]} : vector<4x64xf32> to vector<1x64xf32>
    %78 = tpu.concatenate %74, %74, %75, %75, %76, %76, %77, %77 in 0 : vector<1x64xf32>, vector<1x64xf32>, vector<1x64xf32>, vector<1x64xf32>, vector<1x64xf32>, vector<1x64xf32>, vector<1x64xf32>, vector<1x64xf32> -> vector<8x64xf32>
    %c0_31 = arith.constant 0 : index
    %c0_32 = arith.constant 0 : index
    %c0_33 = arith.constant 0 : index
    %79 = vector.load %arg3[%c0_31, %c0_32, %c0_33] : memref<2x8x64xbf16, #tpu.memory_space<vmem>>, vector<1x8x64xbf16>
    %80 = vector.shape_cast %79 : vector<1x8x64xbf16> to vector<8x64xbf16>
    %81 = arith.extf %80 : vector<8x64xbf16> to vector<8x64xf32>
    %82 = tpu.concatenate %78, %81 in 1 : vector<8x64xf32>, vector<8x64xf32> -> vector<8x128xf32>
    %cst_34 = arith.constant 0.000000e+00 : f32
    %83 = vector.broadcast %cst_34 : f32 to vector<1x128xf32>
    %84 = tpu.concatenate %83, %82, %83 in 0 : vector<1x128xf32>, vector<8x128xf32>, vector<1x128xf32> -> vector<10x128xf32>
    %85 = vector.extract_strided_slice %84 {offsets = [0, 0], sizes = [8, 128], strides = [1, 1]} : vector<10x128xf32> to vector<8x128xf32>
    %86 = vector.extract_strided_slice %84 {offsets = [1, 0], sizes = [8, 128], strides = [1, 1]} : vector<10x128xf32> to vector<8x128xf32>
    %87 = vector.extract_strided_slice %84 {offsets = [2, 0], sizes = [8, 128], strides = [1, 1]} : vector<10x128xf32> to vector<8x128xf32>
    %88 = tpu.concatenate %85, %86, %87 in 1 : vector<8x128xf32>, vector<8x128xf32>, vector<8x128xf32> -> vector<8x384xf32>
    %89 = vector.extract_strided_slice %69 {offsets = [0, 0], sizes = [1, 64], strides = [1, 1]} : vector<4x64xf32> to vector<1x64xf32>
    %90 = vector.extract_strided_slice %69 {offsets = [1, 0], sizes = [1, 64], strides = [1, 1]} : vector<4x64xf32> to vector<1x64xf32>
    %91 = vector.extract_strided_slice %69 {offsets = [2, 0], sizes = [1, 64], strides = [1, 1]} : vector<4x64xf32> to vector<1x64xf32>
    %92 = vector.extract_strided_slice %69 {offsets = [3, 0], sizes = [1, 64], strides = [1, 1]} : vector<4x64xf32> to vector<1x64xf32>
    %93 = tpu.concatenate %89, %89, %90, %90, %91, %91, %92, %92 in 0 : vector<1x64xf32>, vector<1x64xf32>, vector<1x64xf32>, vector<1x64xf32>, vector<1x64xf32>, vector<1x64xf32>, vector<1x64xf32>, vector<1x64xf32> -> vector<8x64xf32>
    %c1_35 = arith.constant 1 : index
    %c0_36 = arith.constant 0 : index
    %c0_37 = arith.constant 0 : index
    %94 = vector.load %arg3[%c1_35, %c0_36, %c0_37] : memref<2x8x64xbf16, #tpu.memory_space<vmem>>, vector<1x8x64xbf16>
    %95 = vector.shape_cast %94 : vector<1x8x64xbf16> to vector<8x64xbf16>
    %96 = arith.extf %95 : vector<8x64xbf16> to vector<8x64xf32>
    %97 = tpu.concatenate %93, %96 in 1 : vector<8x64xf32>, vector<8x64xf32> -> vector<8x128xf32>
    %cst_38 = arith.constant 0.000000e+00 : f32
    %98 = vector.broadcast %cst_38 : f32 to vector<1x128xf32>
    %99 = tpu.concatenate %98, %97, %98 in 0 : vector<1x128xf32>, vector<8x128xf32>, vector<1x128xf32> -> vector<10x128xf32>
    %100 = vector.extract_strided_slice %99 {offsets = [0, 0], sizes = [8, 128], strides = [1, 1]} : vector<10x128xf32> to vector<8x128xf32>
    %101 = vector.extract_strided_slice %99 {offsets = [1, 0], sizes = [8, 128], strides = [1, 1]} : vector<10x128xf32> to vector<8x128xf32>
    %102 = vector.extract_strided_slice %99 {offsets = [2, 0], sizes = [8, 128], strides = [1, 1]} : vector<10x128xf32> to vector<8x128xf32>
    %103 = tpu.concatenate %100, %101, %102 in 1 : vector<8x128xf32>, vector<8x128xf32>, vector<8x128xf32> -> vector<8x384xf32>
    %104 = tpu.concatenate %88, %103 in 0 : vector<8x384xf32>, vector<8x384xf32> -> vector<16x384xf32>
    %105 = arith.truncf %104 : vector<16x384xf32> to vector<16x384xbf16>
    %c0_39 = arith.constant 0 : index
    %c0_40 = arith.constant 0 : index
    %106 = vector.load %arg9[%c0_39, %c0_40] : memref<384x128xbf16, #tpu.memory_space<vmem>>, vector<384x128xbf16>
    %cst_41 = arith.constant dense<0.000000e+00> : vector<16x128xf32>
    %107 = tpu.matmul %105, %106, %cst_41 {dimension_numbers = #tpu.dot_dimension_numbers<[1], [0], [0], [1], [0, 0, 1, 1], [], []>} : vector<16x384xbf16>, vector<384x128xbf16>, vector<16x128xf32> -> vector<16x128xf32>
    %c0_42 = arith.constant 0 : index
    %c0_43 = arith.constant 0 : index
    %108 = vector.load %arg10[%c0_42, %c0_43] : memref<1x128xf32, #tpu.memory_space<vmem>>, vector<1x128xf32>
    %109 = vector.broadcast %108 : vector<1x128xf32> to vector<16x128xf32>
    %110 = arith.addf %107, %109 : vector<16x128xf32>
    %cst_44 = arith.constant 0.000000e+00 : f32
    %111 = vector.broadcast %cst_44 : f32 to vector<16x128xf32>
    %112 = arith.maximumf %110, %111 : vector<16x128xf32>
    %113 = vector.extract_strided_slice %112 {offsets = [0, 0], sizes = [8, 128], strides = [1, 1]} : vector<16x128xf32> to vector<8x128xf32>
    %cst_45 = arith.constant 0.000000e+00 : f32
    %114 = vector.broadcast %cst_45 : f32 to vector<1x128xf32>
    %115 = tpu.concatenate %114, %113, %114 in 0 : vector<1x128xf32>, vector<8x128xf32>, vector<1x128xf32> -> vector<10x128xf32>
    %116 = vector.extract_strided_slice %115 {offsets = [0, 0], sizes = [8, 128], strides = [1, 1]} : vector<10x128xf32> to vector<8x128xf32>
    %117 = vector.extract_strided_slice %115 {offsets = [1, 0], sizes = [8, 128], strides = [1, 1]} : vector<10x128xf32> to vector<8x128xf32>
    %118 = vector.extract_strided_slice %115 {offsets = [2, 0], sizes = [8, 128], strides = [1, 1]} : vector<10x128xf32> to vector<8x128xf32>
    %119 = tpu.concatenate %116, %117, %118 in 1 : vector<8x128xf32>, vector<8x128xf32>, vector<8x128xf32> -> vector<8x384xf32>
    %120 = vector.extract_strided_slice %112 {offsets = [8, 0], sizes = [8, 128], strides = [1, 1]} : vector<16x128xf32> to vector<8x128xf32>
    %cst_46 = arith.constant 0.000000e+00 : f32
    %121 = vector.broadcast %cst_46 : f32 to vector<1x128xf32>
    %122 = tpu.concatenate %121, %120, %121 in 0 : vector<1x128xf32>, vector<8x128xf32>, vector<1x128xf32> -> vector<10x128xf32>
    %123 = vector.extract_strided_slice %122 {offsets = [0, 0], sizes = [8, 128], strides = [1, 1]} : vector<10x128xf32> to vector<8x128xf32>
    %124 = vector.extract_strided_slice %122 {offsets = [1, 0], sizes = [8, 128], strides = [1, 1]} : vector<10x128xf32> to vector<8x128xf32>
    %125 = vector.extract_strided_slice %122 {offsets = [2, 0], sizes = [8, 128], strides = [1, 1]} : vector<10x128xf32> to vector<8x128xf32>
    %126 = tpu.concatenate %123, %124, %125 in 1 : vector<8x128xf32>, vector<8x128xf32>, vector<8x128xf32> -> vector<8x384xf32>
    %127 = tpu.concatenate %119, %126 in 0 : vector<8x384xf32>, vector<8x384xf32> -> vector<16x384xf32>
    %128 = arith.truncf %127 : vector<16x384xf32> to vector<16x384xbf16>
    %c0_47 = arith.constant 0 : index
    %c0_48 = arith.constant 0 : index
    %129 = vector.load %arg11[%c0_47, %c0_48] : memref<384x128xbf16, #tpu.memory_space<vmem>>, vector<384x128xbf16>
    %cst_49 = arith.constant dense<0.000000e+00> : vector<16x128xf32>
    %130 = tpu.matmul %128, %129, %cst_49 {dimension_numbers = #tpu.dot_dimension_numbers<[1], [0], [0], [1], [0, 0, 1, 1], [], []>} : vector<16x384xbf16>, vector<384x128xbf16>, vector<16x128xf32> -> vector<16x128xf32>
    %c0_50 = arith.constant 0 : index
    %c0_51 = arith.constant 0 : index
    %131 = vector.load %arg12[%c0_50, %c0_51] : memref<1x128xf32, #tpu.memory_space<vmem>>, vector<1x128xf32>
    %132 = vector.broadcast %131 : vector<1x128xf32> to vector<16x128xf32>
    %133 = arith.addf %130, %132 : vector<16x128xf32>
    %cst_52 = arith.constant 0.000000e+00 : f32
    %134 = vector.broadcast %cst_52 : f32 to vector<16x128xf32>
    %135 = arith.maximumf %133, %134 : vector<16x128xf32>
    %136 = vector.extract_strided_slice %135 {offsets = [0, 0], sizes = [8, 128], strides = [1, 1]} : vector<16x128xf32> to vector<8x128xf32>
    %137 = arith.truncf %136 : vector<8x128xf32> to vector<8x128xbf16>
    %c0_53 = arith.constant 0 : index
    %c0_54 = arith.constant 0 : index
    %c0_55 = arith.constant 0 : index
    %138 = vector.load %arg22[%c0_53, %c0_54, %c0_55] : memref<2x8x128xbf16, #tpu.memory_space<vmem>>, vector<1x8x128xbf16>
    %139 = vector.shape_cast %138 : vector<1x8x128xbf16> to vector<8x128xbf16>
    %140 = vector.shape_cast %137 : vector<8x128xbf16> to vector<1x8x128xbf16>
    tpu.vector_store %arg22[%c0_53, %c0_54, %c0_55], %140 {strides = array<i32>} : memref<2x8x128xbf16, #tpu.memory_space<vmem>>, vector<1x8x128xbf16>,
    %141 = vector.extract_strided_slice %135 {offsets = [8, 0], sizes = [8, 128], strides = [1, 1]} : vector<16x128xf32> to vector<8x128xf32>
    %142 = arith.truncf %141 : vector<8x128xf32> to vector<8x128xbf16>
    %c1_56 = arith.constant 1 : index
    %c0_57 = arith.constant 0 : index
    %c0_58 = arith.constant 0 : index
    %143 = vector.load %arg22[%c1_56, %c0_57, %c0_58] : memref<2x8x128xbf16, #tpu.memory_space<vmem>>, vector<1x8x128xbf16>
    %144 = vector.shape_cast %143 : vector<1x8x128xbf16> to vector<8x128xbf16>
    %145 = vector.shape_cast %142 : vector<8x128xbf16> to vector<1x8x128xbf16>
    tpu.vector_store %arg22[%c1_56, %c0_57, %c0_58], %145 {strides = array<i32>} : memref<2x8x128xbf16, #tpu.memory_space<vmem>>, vector<1x8x128xbf16>,
    %c0_59 = arith.constant 0 : index
    %c0_60 = arith.constant 0 : index
    %c0_61 = arith.constant 0 : index
    %146 = vector.load %arg4[%c0_59, %c0_60, %c0_61] : memref<2x8x64xbf16, #tpu.memory_space<vmem>>, vector<1x8x64xbf16>
    %147 = vector.shape_cast %146 : vector<1x8x64xbf16> to vector<8x64xbf16>
    %148 = arith.extf %147 : vector<8x64xbf16> to vector<8x64xf32>
    %149 = tpu.concatenate %136, %148 in 1 : vector<8x128xf32>, vector<8x64xf32> -> vector<8x192xf32>
    %cst_62 = arith.constant 0.000000e+00 : f32
    %150 = vector.broadcast %cst_62 : f32 to vector<1x192xf32>
    %151 = tpu.concatenate %150, %149, %150 in 0 : vector<1x192xf32>, vector<8x192xf32>, vector<1x192xf32> -> vector<10x192xf32>
    %152 = vector.extract_strided_slice %151 {offsets = [0, 0], sizes = [8, 192], strides = [1, 1]} : vector<10x192xf32> to vector<8x192xf32>
    %153 = vector.extract_strided_slice %151 {offsets = [1, 0], sizes = [8, 192], strides = [1, 1]} : vector<10x192xf32> to vector<8x192xf32>
    %154 = vector.extract_strided_slice %151 {offsets = [2, 0], sizes = [8, 192], strides = [1, 1]} : vector<10x192xf32> to vector<8x192xf32>
    %155 = tpu.concatenate %152, %153, %154 in 1 : vector<8x192xf32>, vector<8x192xf32>, vector<8x192xf32> -> vector<8x576xf32>
    %c1_63 = arith.constant 1 : index
    %c0_64 = arith.constant 0 : index
    %c0_65 = arith.constant 0 : index
    %156 = vector.load %arg4[%c1_63, %c0_64, %c0_65] : memref<2x8x64xbf16, #tpu.memory_space<vmem>>, vector<1x8x64xbf16>
    %157 = vector.shape_cast %156 : vector<1x8x64xbf16> to vector<8x64xbf16>
    %158 = arith.extf %157 : vector<8x64xbf16> to vector<8x64xf32>
    %159 = tpu.concatenate %141, %158 in 1 : vector<8x128xf32>, vector<8x64xf32> -> vector<8x192xf32>
    %cst_66 = arith.constant 0.000000e+00 : f32
    %160 = vector.broadcast %cst_66 : f32 to vector<1x192xf32>
    %161 = tpu.concatenate %160, %159, %160 in 0 : vector<1x192xf32>, vector<8x192xf32>, vector<1x192xf32> -> vector<10x192xf32>
    %162 = vector.extract_strided_slice %161 {offsets = [0, 0], sizes = [8, 192], strides = [1, 1]} : vector<10x192xf32> to vector<8x192xf32>
    %163 = vector.extract_strided_slice %161 {offsets = [1, 0], sizes = [8, 192], strides = [1, 1]} : vector<10x192xf32> to vector<8x192xf32>
    %164 = vector.extract_strided_slice %161 {offsets = [2, 0], sizes = [8, 192], strides = [1, 1]} : vector<10x192xf32> to vector<8x192xf32>
    %165 = tpu.concatenate %162, %163, %164 in 1 : vector<8x192xf32>, vector<8x192xf32>, vector<8x192xf32> -> vector<8x576xf32>
    %166 = tpu.concatenate %155, %165 in 0 : vector<8x576xf32>, vector<8x576xf32> -> vector<16x576xf32>
    %167 = arith.truncf %166 : vector<16x576xf32> to vector<16x576xbf16>
    %c0_67 = arith.constant 0 : index
    %c0_68 = arith.constant 0 : index
    %168 = vector.load %arg13[%c0_67, %c0_68] : memref<576x64xbf16, #tpu.memory_space<vmem>>, vector<576x64xbf16>
    %cst_69 = arith.constant dense<0.000000e+00> : vector<16x64xf32>
    %169 = tpu.matmul %167, %168, %cst_69 {dimension_numbers = #tpu.dot_dimension_numbers<[1], [0], [0], [1], [0, 0, 1, 1], [], []>} : vector<16x576xbf16>, vector<576x64xbf16>, vector<16x64xf32> -> vector<16x64xf32>
    %c0_70 = arith.constant 0 : index
    %c0_71 = arith.constant 0 : index
    %170 = vector.load %arg14[%c0_70, %c0_71] : memref<1x64xf32, #tpu.memory_space<vmem>>, vector<1x64xf32>
    %171 = vector.broadcast %170 : vector<1x64xf32> to vector<16x64xf32>
    %172 = arith.addf %169, %171 : vector<16x64xf32>
    %cst_72 = arith.constant 0.000000e+00 : f32
    %173 = vector.broadcast %cst_72 : f32 to vector<16x64xf32>
    %174 = arith.maximumf %172, %173 : vector<16x64xf32>
    %175 = vector.extract_strided_slice %174 {offsets = [0, 0], sizes = [8, 64], strides = [1, 1]} : vector<16x64xf32> to vector<8x64xf32>
    %cst_73 = arith.constant 0.000000e+00 : f32
    %176 = vector.broadcast %cst_73 : f32 to vector<1x64xf32>
    %177 = tpu.concatenate %176, %175, %176 in 0 : vector<1x64xf32>, vector<8x64xf32>, vector<1x64xf32> -> vector<10x64xf32>
    %178 = vector.extract_strided_slice %177 {offsets = [0, 0], sizes = [8, 64], strides = [1, 1]} : vector<10x64xf32> to vector<8x64xf32>
    %179 = vector.extract_strided_slice %177 {offsets = [1, 0], sizes = [8, 64], strides = [1, 1]} : vector<10x64xf32> to vector<8x64xf32>
    %180 = vector.extract_strided_slice %177 {offsets = [2, 0], sizes = [8, 64], strides = [1, 1]} : vector<10x64xf32> to vector<8x64xf32>
    %181 = tpu.concatenate %178, %179, %180 in 1 : vector<8x64xf32>, vector<8x64xf32>, vector<8x64xf32> -> vector<8x192xf32>
    %182 = vector.extract_strided_slice %174 {offsets = [8, 0], sizes = [8, 64], strides = [1, 1]} : vector<16x64xf32> to vector<8x64xf32>
    %cst_74 = arith.constant 0.000000e+00 : f32
    %183 = vector.broadcast %cst_74 : f32 to vector<1x64xf32>
    %184 = tpu.concatenate %183, %182, %183 in 0 : vector<1x64xf32>, vector<8x64xf32>, vector<1x64xf32> -> vector<10x64xf32>
    %185 = vector.extract_strided_slice %184 {offsets = [0, 0], sizes = [8, 64], strides = [1, 1]} : vector<10x64xf32> to vector<8x64xf32>
    %186 = vector.extract_strided_slice %184 {offsets = [1, 0], sizes = [8, 64], strides = [1, 1]} : vector<10x64xf32> to vector<8x64xf32>
    %187 = vector.extract_strided_slice %184 {offsets = [2, 0], sizes = [8, 64], strides = [1, 1]} : vector<10x64xf32> to vector<8x64xf32>
    %188 = tpu.concatenate %185, %186, %187 in 1 : vector<8x64xf32>, vector<8x64xf32>, vector<8x64xf32> -> vector<8x192xf32>
    %189 = tpu.concatenate %181, %188 in 0 : vector<8x192xf32>, vector<8x192xf32> -> vector<16x192xf32>
    %190 = arith.truncf %189 : vector<16x192xf32> to vector<16x192xbf16>
    %c0_75 = arith.constant 0 : index
    %c0_76 = arith.constant 0 : index
    %191 = vector.load %arg15[%c0_75, %c0_76] : memref<192x64xbf16, #tpu.memory_space<vmem>>, vector<192x64xbf16>
    %cst_77 = arith.constant dense<0.000000e+00> : vector<16x64xf32>
    %192 = tpu.matmul %190, %191, %cst_77 {dimension_numbers = #tpu.dot_dimension_numbers<[1], [0], [0], [1], [0, 0, 1, 1], [], []>} : vector<16x192xbf16>, vector<192x64xbf16>, vector<16x64xf32> -> vector<16x64xf32>
    %c0_78 = arith.constant 0 : index
    %c0_79 = arith.constant 0 : index
    %193 = vector.load %arg16[%c0_78, %c0_79] : memref<1x64xf32, #tpu.memory_space<vmem>>, vector<1x64xf32>
    %194 = vector.broadcast %193 : vector<1x64xf32> to vector<16x64xf32>
    %195 = arith.addf %192, %194 : vector<16x64xf32>
    %cst_80 = arith.constant 0.000000e+00 : f32
    %196 = vector.broadcast %cst_80 : f32 to vector<16x64xf32>
    %197 = arith.maximumf %195, %196 : vector<16x64xf32>
    %198 = vector.extract_strided_slice %197 {offsets = [0, 0], sizes = [8, 64], strides = [1, 1]} : vector<16x64xf32> to vector<8x64xf32>
    %199 = arith.truncf %198 : vector<8x64xf32> to vector<8x64xbf16>
    %c0_81 = arith.constant 0 : index
    %c0_82 = arith.constant 0 : index
    %c0_83 = arith.constant 0 : index
    %200 = vector.load %arg23[%c0_81, %c0_82, %c0_83] : memref<2x8x64xbf16, #tpu.memory_space<vmem>>, vector<1x8x64xbf16>
    %201 = vector.shape_cast %200 : vector<1x8x64xbf16> to vector<8x64xbf16>
    %202 = vector.shape_cast %199 : vector<8x64xbf16> to vector<1x8x64xbf16>
    tpu.vector_store %arg23[%c0_81, %c0_82, %c0_83], %202 {strides = array<i32>} : memref<2x8x64xbf16, #tpu.memory_space<vmem>>, vector<1x8x64xbf16>,
    %203 = vector.extract_strided_slice %197 {offsets = [8, 0], sizes = [8, 64], strides = [1, 1]} : vector<16x64xf32> to vector<8x64xf32>
    %204 = arith.truncf %203 : vector<8x64xf32> to vector<8x64xbf16>
    %c1_84 = arith.constant 1 : index
    %c0_85 = arith.constant 0 : index
    %c0_86 = arith.constant 0 : index
    %205 = vector.load %arg23[%c1_84, %c0_85, %c0_86] : memref<2x8x64xbf16, #tpu.memory_space<vmem>>, vector<1x8x64xbf16>
    %206 = vector.shape_cast %205 : vector<1x8x64xbf16> to vector<8x64xbf16>
    %207 = vector.shape_cast %204 : vector<8x64xbf16> to vector<1x8x64xbf16>
    tpu.vector_store %arg23[%c1_84, %c0_85, %c0_86], %207 {strides = array<i32>} : memref<2x8x64xbf16, #tpu.memory_space<vmem>>, vector<1x8x64xbf16>,
    %cst_87 = arith.constant 0.000000e+00 : f32
    %208 = vector.broadcast %cst_87 : f32 to vector<1x64xf32>
    %209 = tpu.concatenate %208, %198, %208 in 0 : vector<1x64xf32>, vector<8x64xf32>, vector<1x64xf32> -> vector<10x64xf32>
    %210 = vector.extract_strided_slice %209 {offsets = [0, 0], sizes = [8, 64], strides = [1, 1]} : vector<10x64xf32> to vector<8x64xf32>
    %211 = vector.extract_strided_slice %209 {offsets = [1, 0], sizes = [8, 64], strides = [1, 1]} : vector<10x64xf32> to vector<8x64xf32>
    %212 = vector.extract_strided_slice %209 {offsets = [2, 0], sizes = [8, 64], strides = [1, 1]} : vector<10x64xf32> to vector<8x64xf32>
    %213 = tpu.concatenate %210, %211, %212 in 1 : vector<8x64xf32>, vector<8x64xf32>, vector<8x64xf32> -> vector<8x192xf32>
    %cst_88 = arith.constant 0.000000e+00 : f32
    %214 = vector.broadcast %cst_88 : f32 to vector<1x64xf32>
    %215 = tpu.concatenate %214, %203, %214 in 0 : vector<1x64xf32>, vector<8x64xf32>, vector<1x64xf32> -> vector<10x64xf32>
    %216 = vector.extract_strided_slice %215 {offsets = [0, 0], sizes = [8, 64], strides = [1, 1]} : vector<10x64xf32> to vector<8x64xf32>
    %217 = vector.extract_strided_slice %215 {offsets = [1, 0], sizes = [8, 64], strides = [1, 1]} : vector<10x64xf32> to vector<8x64xf32>
    %218 = vector.extract_strided_slice %215 {offsets = [2, 0], sizes = [8, 64], strides = [1, 1]} : vector<10x64xf32> to vector<8x64xf32>
    %219 = tpu.concatenate %216, %217, %218 in 1 : vector<8x64xf32>, vector<8x64xf32>, vector<8x64xf32> -> vector<8x192xf32>
    %220 = tpu.concatenate %213, %219 in 0 : vector<8x192xf32>, vector<8x192xf32> -> vector<16x192xf32>
    %221 = arith.truncf %220 : vector<16x192xf32> to vector<16x192xbf16>
    %c0_89 = arith.constant 0 : index
    %c0_90 = arith.constant 0 : index
    %222 = vector.load %arg17[%c0_89, %c0_90] : memref<192x64xbf16, #tpu.memory_space<vmem>>, vector<192x64xbf16>
    %cst_91 = arith.constant dense<0.000000e+00> : vector<16x64xf32>
    %223 = tpu.matmul %221, %222, %cst_91 {dimension_numbers = #tpu.dot_dimension_numbers<[1], [0], [0], [1], [0, 0, 1, 1], [], []>} : vector<16x192xbf16>, vector<192x64xbf16>, vector<16x64xf32> -> vector<16x64xf32>
    %c0_92 = arith.constant 0 : index
    %c0_93 = arith.constant 0 : index
    %224 = vector.load %arg18[%c0_92, %c0_93] : memref<1x64xf32, #tpu.memory_space<vmem>>, vector<1x64xf32>
    %225 = vector.broadcast %224 : vector<1x64xf32> to vector<16x64xf32>
    %226 = arith.addf %223, %225 : vector<16x64xf32>
    %cst_94 = arith.constant 0.000000e+00 : f32
    %227 = vector.broadcast %cst_94 : f32 to vector<16x64xf32>
    %228 = arith.maximumf %226, %227 : vector<16x64xf32>
    %229 = vector.extract_strided_slice %228 {offsets = [0, 0], sizes = [8, 64], strides = [1, 1]} : vector<16x64xf32> to vector<8x64xf32>
    %cst_95 = arith.constant 0.000000e+00 : f32
    %230 = vector.broadcast %cst_95 : f32 to vector<1x64xf32>
    %231 = tpu.concatenate %230, %229, %230 in 0 : vector<1x64xf32>, vector<8x64xf32>, vector<1x64xf32> -> vector<10x64xf32>
    %232 = vector.extract_strided_slice %231 {offsets = [0, 0], sizes = [8, 64], strides = [1, 1]} : vector<10x64xf32> to vector<8x64xf32>
    %233 = vector.extract_strided_slice %231 {offsets = [1, 0], sizes = [8, 64], strides = [1, 1]} : vector<10x64xf32> to vector<8x64xf32>
    %234 = vector.extract_strided_slice %231 {offsets = [2, 0], sizes = [8, 64], strides = [1, 1]} : vector<10x64xf32> to vector<8x64xf32>
    %235 = tpu.concatenate %232, %233, %234 in 1 : vector<8x64xf32>, vector<8x64xf32>, vector<8x64xf32> -> vector<8x192xf32>
    %236 = vector.extract_strided_slice %228 {offsets = [8, 0], sizes = [8, 64], strides = [1, 1]} : vector<16x64xf32> to vector<8x64xf32>
    %cst_96 = arith.constant 0.000000e+00 : f32
    %237 = vector.broadcast %cst_96 : f32 to vector<1x64xf32>
    %238 = tpu.concatenate %237, %236, %237 in 0 : vector<1x64xf32>, vector<8x64xf32>, vector<1x64xf32> -> vector<10x64xf32>
    %239 = vector.extract_strided_slice %238 {offsets = [0, 0], sizes = [8, 64], strides = [1, 1]} : vector<10x64xf32> to vector<8x64xf32>
    %240 = vector.extract_strided_slice %238 {offsets = [1, 0], sizes = [8, 64], strides = [1, 1]} : vector<10x64xf32> to vector<8x64xf32>
    %241 = vector.extract_strided_slice %238 {offsets = [2, 0], sizes = [8, 64], strides = [1, 1]} : vector<10x64xf32> to vector<8x64xf32>
    %242 = tpu.concatenate %239, %240, %241 in 1 : vector<8x64xf32>, vector<8x64xf32>, vector<8x64xf32> -> vector<8x192xf32>
    %243 = tpu.concatenate %235, %242 in 0 : vector<8x192xf32>, vector<8x192xf32> -> vector<16x192xf32>
    %244 = arith.truncf %243 : vector<16x192xf32> to vector<16x192xbf16>
    %c0_97 = arith.constant 0 : index
    %c0_98 = arith.constant 0 : index
    %245 = vector.load %arg19[%c0_97, %c0_98] : memref<192x64xbf16, #tpu.memory_space<vmem>>, vector<192x64xbf16>
    %cst_99 = arith.constant dense<0.000000e+00> : vector<16x64xf32>
    %246 = tpu.matmul %244, %245, %cst_99 {dimension_numbers = #tpu.dot_dimension_numbers<[1], [0], [0], [1], [0, 0, 1, 1], [], []>} : vector<16x192xbf16>, vector<192x64xbf16>, vector<16x64xf32> -> vector<16x64xf32>
    %c0_100 = arith.constant 0 : index
    %c0_101 = arith.constant 0 : index
    %247 = vector.load %arg20[%c0_100, %c0_101] : memref<1x64xf32, #tpu.memory_space<vmem>>, vector<1x64xf32>
    %248 = vector.broadcast %247 : vector<1x64xf32> to vector<16x64xf32>
    %249 = arith.addf %246, %248 : vector<16x64xf32>
    %cst_102 = arith.constant 0.000000e+00 : f32
    %250 = vector.broadcast %cst_102 : f32 to vector<16x64xf32>
    %251 = arith.maximumf %249, %250 : vector<16x64xf32>
    %252 = vector.extract_strided_slice %251 {offsets = [0, 0], sizes = [8, 64], strides = [1, 1]} : vector<16x64xf32> to vector<8x64xf32>
    %253 = arith.truncf %252 : vector<8x64xf32> to vector<8x64xbf16>
    %c0_103 = arith.constant 0 : index
    %c0_104 = arith.constant 0 : index
    %c0_105 = arith.constant 0 : index
    %254 = vector.load %arg24[%c0_103, %c0_104, %c0_105] : memref<2x8x64xbf16, #tpu.memory_space<vmem>>, vector<1x8x64xbf16>
    %255 = vector.shape_cast %254 : vector<1x8x64xbf16> to vector<8x64xbf16>
    %256 = vector.shape_cast %253 : vector<8x64xbf16> to vector<1x8x64xbf16>
    tpu.vector_store %arg24[%c0_103, %c0_104, %c0_105], %256 {strides = array<i32>} : memref<2x8x64xbf16, #tpu.memory_space<vmem>>, vector<1x8x64xbf16>,
    %257 = vector.extract_strided_slice %251 {offsets = [8, 0], sizes = [8, 64], strides = [1, 1]} : vector<16x64xf32> to vector<8x64xf32>
    %258 = arith.truncf %257 : vector<8x64xf32> to vector<8x64xbf16>
    %c1_106 = arith.constant 1 : index
    %c0_107 = arith.constant 0 : index
    %c0_108 = arith.constant 0 : index
    %259 = vector.load %arg24[%c1_106, %c0_107, %c0_108] : memref<2x8x64xbf16, #tpu.memory_space<vmem>>, vector<1x8x64xbf16>
    %260 = vector.shape_cast %259 : vector<1x8x64xbf16> to vector<8x64xbf16>
    %261 = vector.shape_cast %258 : vector<8x64xbf16> to vector<1x8x64xbf16>
    tpu.vector_store %arg24[%c1_106, %c0_107, %c0_108], %261 {strides = array<i32>} : memref<2x8x64xbf16, #tpu.memory_space<vmem>>, vector<1x8x64xbf16>,
    return
  }
  func.func @transform_0(%arg0: i32) -> (i32, i32, i32) {
    %c0_i32 = arith.constant 0 : i32
    %c0_i32_0 = arith.constant 0 : i32
    %c0_i32_1 = arith.constant 0 : i32
    return %arg0, %c0_i32, %c0_i32_0 : i32, i32, i32
  }
  func.func @transform_1(%arg0: i32) -> (i32, i32, i32) {
    %c0_i32 = arith.constant 0 : i32
    %c0_i32_0 = arith.constant 0 : i32
    %c0_i32_1 = arith.constant 0 : i32
    return %arg0, %c0_i32, %c0_i32_0 : i32, i32, i32
  }
  func.func @transform_2(%arg0: i32) -> (i32, i32, i32) {
    %c0_i32 = arith.constant 0 : i32
    %c0_i32_0 = arith.constant 0 : i32
    %c0_i32_1 = arith.constant 0 : i32
    return %arg0, %c0_i32, %c0_i32_0 : i32, i32, i32
  }
  func.func @transform_3(%arg0: i32) -> (i32, i32, i32) {
    %c0_i32 = arith.constant 0 : i32
    %c0_i32_0 = arith.constant 0 : i32
    %c0_i32_1 = arith.constant 0 : i32
    return %arg0, %c0_i32, %c0_i32_0 : i32, i32, i32
  }
  func.func @transform_4(%arg0: i32) -> (i32, i32) {
    %c0_i32 = arith.constant 0 : i32
    %c0_i32_0 = arith.constant 0 : i32
    %c0_i32_1 = arith.constant 0 : i32
    return %c0_i32, %c0_i32_0 : i32, i32
  }
  func.func @transform_5(%arg0: i32) -> (i32, i32) {
    %c0_i32 = arith.constant 0 : i32
    %c0_i32_0 = arith.constant 0 : i32
    %c0_i32_1 = arith.constant 0 : i32
    return %c0_i32, %c0_i32_0 : i32, i32
  }
  func.func @transform_6(%arg0: i32) -> (i32, i32) {
    %c0_i32 = arith.constant 0 : i32
    %c0_i32_0 = arith.constant 0 : i32
    %c0_i32_1 = arith.constant 0 : i32
    return %c0_i32, %c0_i32_0 : i32, i32
  }
  func.func @transform_7(%arg0: i32) -> (i32, i32) {
    %c0_i32 = arith.constant 0 : i32
    %c0_i32_0 = arith.constant 0 : i32
    %c0_i32_1 = arith.constant 0 : i32
    return %c0_i32, %c0_i32_0 : i32, i32
  }
  func.func @transform_8(%arg0: i32) -> (i32, i32) {
    %c0_i32 = arith.constant 0 : i32
    %c0_i32_0 = arith.constant 0 : i32
    %c0_i32_1 = arith.constant 0 : i32
    return %c0_i32, %c0_i32_0 : i32, i32
  }
  func.func @transform_9(%arg0: i32) -> (i32, i32) {
    %c0_i32 = arith.constant 0 : i32
    %c0_i32_0 = arith.constant 0 : i32
    %c0_i32_1 = arith.constant 0 : i32
    return %c0_i32, %c0_i32_0 : i32, i32
  }
  func.func @transform_10(%arg0: i32) -> (i32, i32) {
    %c0_i32 = arith.constant 0 : i32
    %c0_i32_0 = arith.constant 0 : i32
    %c0_i32_1 = arith.constant 0 : i32
    return %c0_i32, %c0_i32_0 : i32, i32
  }
  func.func @transform_11(%arg0: i32) -> (i32, i32) {
    %c0_i32 = arith.constant 0 : i32
    %c0_i32_0 = arith.constant 0 : i32
    %c0_i32_1 = arith.constant 0 : i32
    return %c0_i32, %c0_i32_0 : i32, i32
  }
  func.func @transform_12(%arg0: i32) -> (i32, i32) {
    %c0_i32 = arith.constant 0 : i32
    %c0_i32_0 = arith.constant 0 : i32
    %c0_i32_1 = arith.constant 0 : i32
    return %c0_i32, %c0_i32_0 : i32, i32
  }
  func.func @transform_13(%arg0: i32) -> (i32, i32) {
    %c0_i32 = arith.constant 0 : i32
    %c0_i32_0 = arith.constant 0 : i32
    %c0_i32_1 = arith.constant 0 : i32
    return %c0_i32, %c0_i32_0 : i32, i32
  }
  func.func @transform_14(%arg0: i32) -> (i32, i32) {
    %c0_i32 = arith.constant 0 : i32
    %c0_i32_0 = arith.constant 0 : i32
    %c0_i32_1 = arith.constant 0 : i32
    return %c0_i32, %c0_i32_0 : i32, i32
  }
  func.func @transform_15(%arg0: i32) -> (i32, i32) {
    %c0_i32 = arith.constant 0 : i32
    %c0_i32_0 = arith.constant 0 : i32
    %c0_i32_1 = arith.constant 0 : i32
    return %c0_i32, %c0_i32_0 : i32, i32
  }
  func.func @transform_16(%arg0: i32) -> (i32, i32) {
    %c0_i32 = arith.constant 0 : i32
    %c0_i32_0 = arith.constant 0 : i32
    %c0_i32_1 = arith.constant 0 : i32
    return %c0_i32, %c0_i32_0 : i32, i32
  }
  func.func @transform_17(%arg0: i32) -> (i32, i32) {
    %c0_i32 = arith.constant 0 : i32
    %c0_i32_0 = arith.constant 0 : i32
    %c0_i32_1 = arith.constant 0 : i32
    return %c0_i32, %c0_i32_0 : i32, i32
  }
  func.func @transform_18(%arg0: i32) -> (i32, i32) {
    %c0_i32 = arith.constant 0 : i32
    %c0_i32_0 = arith.constant 0 : i32
    %c0_i32_1 = arith.constant 0 : i32
    return %c0_i32, %c0_i32_0 : i32, i32
  }
  func.func @transform_19(%arg0: i32) -> (i32, i32) {
    %c0_i32 = arith.constant 0 : i32
    %c0_i32_0 = arith.constant 0 : i32
    %c0_i32_1 = arith.constant 0 : i32
    return %c0_i32, %c0_i32_0 : i32, i32
  }
  func.func @transform_20(%arg0: i32) -> (i32, i32, i32) {
    %c0_i32 = arith.constant 0 : i32
    %c0_i32_0 = arith.constant 0 : i32
    %c0_i32_1 = arith.constant 0 : i32
    return %arg0, %c0_i32, %c0_i32_0 : i32, i32, i32
  }
  func.func @transform_21(%arg0: i32) -> (i32, i32, i32) {
    %c0_i32 = arith.constant 0 : i32
    %c0_i32_0 = arith.constant 0 : i32
    %c0_i32_1 = arith.constant 0 : i32
    return %arg0, %c0_i32, %c0_i32_0 : i32, i32, i32
  }
  func.func @transform_22(%arg0: i32) -> (i32, i32, i32) {
    %c0_i32 = arith.constant 0 : i32
    %c0_i32_0 = arith.constant 0 : i32
    %c0_i32_1 = arith.constant 0 : i32
    return %arg0, %c0_i32, %c0_i32_0 : i32, i32, i32
  }
  func.func @transform_23(%arg0: i32) -> (i32, i32, i32) {
    %c0_i32 = arith.constant 0 : i32
    %c0_i32_0 = arith.constant 0 : i32
    %c0_i32_1 = arith.constant 0 : i32
    return %arg0, %c0_i32, %c0_i32_0 : i32, i32, i32
  }
}

</mosaic_0001>

<bundles_post_ra>
// kernel: tile.34
= control target key start
LH: loop header
LB: loop body
LE: loop exit
PB: predicated region body
PF: predicated region fallthrough
CT: control target
= control target key end

     0   :  { %s22_s0 = inlined_call_operand.vmem [shape: f32[16], index: 0, kind: input, shape index: {}]   ;;  %s23_s1 = inlined_call_operand.vmem [shape: f32[4,16], index: 1, kind: output, shape index: {}]  }
   0x1   :  { %v4_v0 = vld [vmem:[%s22_s0] ss:$0 sm:$0xff] }
   0x2   :  { %5 = vst [vmem:[%s23_s1] sm:$0xf] %v4_v0 }

// kernel: tile.35
= control target key start
LH: loop header
LB: loop body
LE: loop exit
PB: predicated region body
PF: predicated region fallthrough
CT: control target
= control target key end

     0   :  { %vm7_vm0 = vcmask 130048   ;;  %s37_s8 = smov 16   ;;  %s38_s9 = smov 32   ;;  %vm13_vm1 = vcmask 523648   ;;  %vm19_vm2 = vcmask 392448   ;;  %vm25_vm3 = vcmask 261248   ;;  %s55_s0 = inlined_call_operand.vmem [shape: f32[4,16], index: 0, kind: input, shape index: {}]   ;;  %s56_s1 = inlined_call_operand.vmem [shape: f32[1,64], index: 1, kind: output, shape index: {}]  }
   0x1   :  { %v4_v0 = vld [vmem:[%s55_s0] sm:$0xf]  ;;  %s36_s0 = smov 48  }
   0x2   :  { %5 = vst [vmem:[#allocation1] sm:$0xf] %v4_v0 }
   0x9   :  { %v10_v1 = vld [vmem:[#allocation1 + $0x3] sm:$0x1]   ;;  %v22_v2 = vld [vmem:[#allocation1 + $0x1] sm:$0x1]   ;;  %v6_v3 = vld [vmem:[#allocation1] sm:$0x1]  }
   0xa   :  { %11 = vrot.lane.b32.xlu0 %v10_v1, %s36_s0  ;;  %23 = vrot.lane.b32.xlu1 %v22_v2, %s37_s8  ;;  %v16_v4 = vld [vmem:[#allocation1 + $0x2] sm:$0x1]   ;;  %8 = vst.msk [vmem:[#allocation0] sm:$0x1] %vm7_vm0, %v6_v3  }
   0xe   :  { %17 = vrot.lane.b32.xlu0 %v16_v4, %s38_s9 }
  0x7c   :  { %v12_v5 = vpop.permute.xlu0 %11   ;;  %v24_v6 = vpop.permute.xlu1 %23  }
  0x7d   :  { %14 = vst.msk [vmem:[#allocation0] sm:$0x1] %vm13_vm1, %v12_v5  }
  0x80   :  { %v18_v7 = vpop.permute.xlu0 %17  }
  0x81   :  { %20 = vst.msk [vmem:[#allocation0] sm:$0x1] %vm19_vm2, %v18_v7  }
  0x82   :  { %26 = vst.msk [vmem:[#allocation0] sm:$0x1] %vm25_vm3, %v24_v6  }
  0x89   :  { %v30_v8 = vld [vmem:[#allocation0] sm:$0x1] }
  0x8a   :  { %32 = vst [vmem:[%s56_s1] sm:$0x1] %v30_v8 }

// kernel: tile.43
= control target key start
LH: loop header
LB: loop body
LE: loop exit
PB: predicated region body
PF: predicated region fallthrough
CT: control target
= control target key end

     0   :  { %s67_s10 = smov 112   ;;  %s68_s11 = smov 80   ;;  %vm3_vm0 = vcmask 130048   ;;  %vm9_vm1 = vcmask 1048448   ;;  %vm15_vm2 = vcmask 917248   ;;  %vm21_vm3 = vcmask 786048   ;;  %s111_s0 = inlined_call_operand.vmem [shape: f32[8,16], index: 0, kind: input, shape index: {}]   ;;  %s112_s1 = inlined_call_operand.vmem [shape: f32[1,128], index: 1, kind: output, shape index: {}]  }
   0x1   :  { %v53_v0 = vld [vmem:[%s111_s0 + $0x7] sm:$0x1]   ;;  %v55_v1 = vld [vmem:[%s111_s0 + $0x5] sm:$0x1]   ;;  %v54_v2 = vld [vmem:[%s111_s0 + $0x6] sm:$0x1]  }
   0x2   :  { %7 = vrot.lane.b32.xlu0 %v53_v0, %s67_s10  ;;  %19 = vrot.lane.b32.xlu1 %v55_v1, %s68_s11  ;;  %v56_v3 = vld [vmem:[%s111_s0 + $0x4] sm:$0x1]   ;;  %v2_v4 = vld [vmem:[%s111_s0] sm:$0x1]   ;;  %s69_s18 = smov 96   ;;  %s70_s19 = smov 64  }
   0x3   :  { %4 = vst.msk [vmem:[#allocation0] sm:$0x1] %vm3_vm0, %v2_v4   ;;  %v57_v5 = vld [vmem:[%s111_s0 + $0x3] sm:$0x1]   ;;  %v58_v6 = vld [vmem:[%s111_s0 + $0x2] sm:$0x1]  }
   0x4   :  { %s71_s24 = smov 48   ;;  %s72_s25 = smov 32   ;;  %v59_v7 = vld [vmem:[%s111_s0 + $0x1] sm:$0x1]   ;;  %vm27_vm4 = vcmask 654848   ;;  %vm33_vm5 = vcmask 523648  }
   0x5   :  { %s73_s0 = smov 16   ;;  %vm39_vm6 = vcmask 392448   ;;  %vm45_vm7 = vcmask 261248  }
   0x6   :  { %13 = vrot.lane.b32.xlu0 %v54_v2, %s69_s18  ;;  %25 = vrot.lane.b32.xlu1 %v56_v3, %s70_s19 }
   0xa   :  { %31 = vrot.lane.b32.xlu0 %v57_v5, %s71_s24  ;;  %37 = vrot.lane.b32.xlu1 %v58_v6, %s72_s25 }
   0xe   :  { %43 = vrot.lane.b32.xlu0 %v59_v7, %s73_s0 }
  0x74   :  { %v8_v8 = vpop.permute.xlu0 %7   ;;  %v20_v9 = vpop.permute.xlu1 %19  }
  0x75   :  { %10 = vst.msk [vmem:[#allocation0] sm:$0x1] %vm9_vm1, %v8_v8  }
  0x78   :  { %v14_v10 = vpop.permute.xlu0 %13   ;;  %v26_v11 = vpop.permute.xlu1 %25  }
  0x79   :  { %16 = vst.msk [vmem:[#allocation0] sm:$0x1] %vm15_vm2, %v14_v10  }
  0x7a   :  { %22 = vst.msk [vmem:[#allocation0] sm:$0x1] %vm21_vm3, %v20_v9  }
  0x7b   :  { %28 = vst.msk [vmem:[#allocation0] sm:$0x1] %vm27_vm4, %v26_v11  }
  0x7c   :  { %v32_v12 = vpop.permute.xlu0 %31   ;;  %v38_v13 = vpop.permute.xlu1 %37  }
  0x7d   :  { %34 = vst.msk [vmem:[#allocation0] sm:$0x1] %vm33_vm5, %v32_v12  }
  0x7e   :  { %40 = vst.msk [vmem:[#allocation0] sm:$0x1] %vm39_vm6, %v38_v13  }
  0x80   :  { %v44_v14 = vpop.permute.xlu0 %43  }
  0x81   :  { %46 = vst.msk [vmem:[#allocation0] sm:$0x1] %vm45_vm7, %v44_v14  }
  0x88   :  { %v50_v15 = vld [vmem:[#allocation0] sm:$0x1] }
  0x89   :  { %52 = vst [vmem:[%s112_s1] sm:$0x1] %v50_v15 }

// kernel: tile.42
= control target key start
LH: loop header
LB: loop body
LE: loop exit
PB: predicated region body
PF: predicated region fallthrough
CT: control target
= control target key end

     0   :  { %s22_s0 = inlined_call_operand.vmem [shape: f32[16], index: 0, kind: input, shape index: {}]   ;;  %s23_s1 = inlined_call_operand.vmem [shape: f32[8,16], index: 1, kind: output, shape index: {}]  }
   0x1   :  { %v4_v0 = vld [vmem:[%s22_s0] ss:$0 sm:$0xff] }
   0x2   :  { %5 = vst [vmem:[%s23_s1] sm:$0xff] %v4_v0 }

// kernel: tile.51
= control target key start
LH: loop header
LB: loop body
LE: loop exit
PB: predicated region body
PF: predicated region fallthrough
CT: control target
= control target key end

     0   :  { %s67_s10 = smov 56   ;;  %s68_s11 = smov 40   ;;  %vm3_vm0 = vcmask 64512   ;;  %vm9_vm1 = vcmask 523712   ;;  %vm15_vm2 = vcmask 458112   ;;  %vm21_vm3 = vcmask 392512   ;;  %s111_s0 = inlined_call_operand.vmem [shape: f32[8,8], index: 0, kind: input, shape index: {}]   ;;  %s112_s1 = inlined_call_operand.vmem [shape: f32[1,64], index: 1, kind: output, shape index: {}]  }
   0x1   :  { %v53_v0 = vld [vmem:[%s111_s0 + $0x7] sm:$0x1]   ;;  %v55_v1 = vld [vmem:[%s111_s0 + $0x5] sm:$0x1]   ;;  %v54_v2 = vld [vmem:[%s111_s0 + $0x6] sm:$0x1]  }
   0x2   :  { %7 = vrot.lane.b32.xlu0 %v53_v0, %s67_s10  ;;  %19 = vrot.lane.b32.xlu1 %v55_v1, %s68_s11  ;;  %v56_v3 = vld [vmem:[%s111_s0 + $0x4] sm:$0x1]   ;;  %v2_v4 = vld [vmem:[%s111_s0] sm:$0x1]   ;;  %s69_s18 = smov 48   ;;  %s70_s19 = smov 32  }
   0x3   :  { %4 = vst.msk [vmem:[#allocation0] sm:$0x1] %vm3_vm0, %v2_v4   ;;  %v57_v5 = vld [vmem:[%s111_s0 + $0x3] sm:$0x1]   ;;  %v58_v6 = vld [vmem:[%s111_s0 + $0x2] sm:$0x1]  }
   0x4   :  { %s71_s24 = smov 24   ;;  %s72_s25 = smov 16   ;;  %v59_v7 = vld [vmem:[%s111_s0 + $0x1] sm:$0x1]   ;;  %vm27_vm4 = vcmask 326912   ;;  %vm33_vm5 = vcmask 261312  }
   0x5   :  { %s73_s0 = smov 8   ;;  %vm39_vm6 = vcmask 195712   ;;  %vm45_vm7 = vcmask 130112  }
   0x6   :  { %13 = vrot.lane.b32.xlu0 %v54_v2, %s69_s18  ;;  %25 = vrot.lane.b32.xlu1 %v56_v3, %s70_s19 }
   0xa   :  { %31 = vrot.lane.b32.xlu0 %v57_v5, %s71_s24  ;;  %37 = vrot.lane.b32.xlu1 %v58_v6, %s72_s25 }
   0xe   :  { %43 = vrot.lane.b32.xlu0 %v59_v7, %s73_s0 }
  0x74   :  { %v8_v8 = vpop.permute.xlu0 %7   ;;  %v20_v9 = vpop.permute.xlu1 %19  }
  0x75   :  { %10 = vst.msk [vmem:[#allocation0] sm:$0x1] %vm9_vm1, %v8_v8  }
  0x78   :  { %v14_v10 = vpop.permute.xlu0 %13   ;;  %v26_v11 = vpop.permute.xlu1 %25  }
  0x79   :  { %16 = vst.msk [vmem:[#allocation0] sm:$0x1] %vm15_vm2, %v14_v10  }
  0x7a   :  { %22 = vst.msk [vmem:[#allocation0] sm:$0x1] %vm21_vm3, %v20_v9  }
  0x7b   :  { %28 = vst.msk [vmem:[#allocation0] sm:$0x1] %vm27_vm4, %v26_v11  }
  0x7c   :  { %v32_v12 = vpop.permute.xlu0 %31   ;;  %v38_v13 = vpop.permute.xlu1 %37  }
  0x7d   :  { %34 = vst.msk [vmem:[#allocation0] sm:$0x1] %vm33_vm5, %v32_v12  }
  0x7e   :  { %40 = vst.msk [vmem:[#allocation0] sm:$0x1] %vm39_vm6, %v38_v13  }
  0x80   :  { %v44_v14 = vpop.permute.xlu0 %43  }
  0x81   :  { %46 = vst.msk [vmem:[#allocation0] sm:$0x1] %vm45_vm7, %v44_v14  }
  0x88   :  { %v50_v15 = vld [vmem:[#allocation0] sm:$0x1] }
  0x89   :  { %52 = vst [vmem:[%s112_s1] sm:$0x1] %v50_v15 }

// kernel: tile.50
= control target key start
LH: loop header
LB: loop body
LE: loop exit
PB: predicated region body
PF: predicated region fallthrough
CT: control target
= control target key end

     0   :  { %s22_s0 = inlined_call_operand.vmem [shape: f32[8], index: 0, kind: input, shape index: {}]   ;;  %s23_s1 = inlined_call_operand.vmem [shape: f32[8,8], index: 1, kind: output, shape index: {}]  }
   0x1   :  { %v4_v0 = vld [vmem:[%s22_s0] ss:$0 sm:$0xff] }
   0x2   :  { %5 = vst [vmem:[%s23_s1] sm:$0xff] %v4_v0 }

// kernel: _lambda_.1
= control target key start
LH: loop header
LB: loop body
LE: loop exit
PB: predicated region body
PF: predicated region fallthrough
CT: control target
= control target key end

     0   :  { %s4800_s0 = inlined_call_operand.vmem [shape: bf16[4,2,32], index: 0, kind: input, shape index: {}]   ;;  %s4801_s1 = inlined_call_operand.vmem [shape: bf16[4,4,64], index: 1, kind: input, shape index: {}]   ;;  %s4802_s2 = inlined_call_operand.vmem [shape: bf16[4,8,64], index: 2, kind: input, shape index: {}]   ;;  %s4803_s3 = inlined_call_operand.vmem [shape: bf16[4,8,64], index: 3, kind: input, shape index: {}]   ;;  %s4804_s4 = inlined_call_operand.vmem [shape: bf16[288,64], index: 4, kind: input, shape index: {}]   ;;  %s4805_s5 = inlined_call_operand.vmem [shape: f32[1,64], index: 5, kind: input, shape index: {}]   ;;  %s4806_s6 = inlined_call_operand.vmem [shape: bf16[192,64], index: 6, kind: input, shape index: {}]   ;;  %s4807_s7 = inlined_call_operand.vmem [shape: f32[1,64], index: 7, kind: input, shape index: {}]   ;;  %s4808_s8 = inlined_call_operand.vmem [shape: bf16[384,128], index: 8, kind: input, shape index: {}]   ;;  %s4809_s9 = inlined_call_operand.vmem [shape: f32[1,128], index: 9, kind: input, shape index: {}]   ;;  %s4810_s10 = inlined_call_operand.vmem [shape: bf16[384,128], index: 10, kind: input, shape index: {}]   ;;  %s4811_s11 = inlined_call_operand.vmem [shape: f32[1,128], index: 11, kind: input, shape index: {}]   ;;  %s4812_s12 = inlined_call_operand.vmem [shape: bf16[576,64], index: 12, kind: input, shape index: {}]   ;;  %s4813_s13 = inlined_call_operand.vmem [shape: f32[1,64], index: 13, kind: input, shape index: {}]   ;;  %s4814_s14 = inlined_call_operand.vmem [shape: bf16[192,64], index: 14, kind: input, shape index: {}]   ;;  %s4815_s15 = inlined_call_operand.vmem [shape: f32[1,64], index: 15, kind: input, shape index: {}]   ;;  %s4816_s16 = inlined_call_operand.vmem [shape: bf16[192,64], index: 16, kind: input, shape index: {}]   ;;  %s4817_s17 = inlined_call_operand.vmem [shape: f32[1,64], index: 17, kind: input, shape index: {}]   ;;  %s4818_s18 = inlined_call_operand.vmem [shape: bf16[192,64], index: 18, kind: input, shape index: {}]   ;;  %s4819_s19 = inlined_call_operand.vmem [shape: f32[1,64], index: 19, kind: input, shape index: {}]   ;;  %s4820_s20 = inlined_call_operand.vmem [shape: bf16[4,4,64], index: 20, kind: output, shape index: {0}]   ;;  %s4821_s21 = inlined_call_operand.vmem [shape: bf16[4,8,128], index: 21, kind: output, shape index: {1}]   ;;  %s4822_s22 = inlined_call_operand.vmem [shape: bf16[4,8,64], index: 22, kind: output, shape index: {2}]   ;;  %s4823_s23 = inlined_call_operand.vmem [shape: bf16[4,8,64], index: 23, kind: output, shape index: {3}]  }
   0x1   :  { %4829 = sst [smem:[#allocation2_spill]] %s4800_s0 }
   0x2   :  { %4830 = sst [smem:[#allocation3_spill]] %s4801_s1 }
   0x3   :  { %4831 = sst [smem:[#allocation4_spill]] %s4802_s2 }
   0x4   :  { %4832 = sst [smem:[#allocation5_spill]] %s4803_s3 }
   0x5   :  { %4833 = sst [smem:[#allocation6_spill]] %s4804_s4  ;;  %s4047_s4 = smov 0  }
   0x6   :  { %4834 = sst [smem:[#allocation7_spill]] %s4805_s5 }
   0x7   :  { %4835 = sst [smem:[#allocation8_spill]] %s4806_s6 }
   0x8   :  { %4836 = sst [smem:[#allocation9_spill]] %s4807_s7 }
   0x9 LB: > { %s3301_s30 = sadd.s32 4294967295, %s3918_s4   ;;  %p3305_p0 = scmp.ge.s32.totalorder %s3918_s4, 1  ;;  %s3918_s4 = sphi %s4047_s4, %s34_s4  }
   0xa   : > { %p677_p1 = scmp.lt.s32.totalorder %s3918_s4, 3 }
   0xc   : > { %p678_p2 = pnand %p3305_p0, %p677_p1 }
   0xd   : > { %s3306_s24 = sshll.u32 (!%p678_p2), %s3301_s30, 1  ;;  %s4837_s26 = sld [smem:[#allocation3_spill]] (!%p678_p2)  ;;  %v824_v4 = vlaneseq (!%p678_p2)  ;;  %vm834_vm0 = vcmask (!%p678_p2), 1040384   ;;  %vm836_vm1 = vcmask (!%p678_p2), 1041408   ;;  %vm838_vm2 = vcmask (!%p678_p2), 1042432  }
   0xe   : > { %681 = sbr.rel (%p678_p2) target bundleno = 2723 (0xaa3), region = 100  ;;  %p771_p3 = scmp.lt.s32.totalorder (!%p678_p2), %s3306_s24, 3  ;;  %vm846_vm3 = vcmask (!%p678_p2), 261120   ;;  %v3921_v38 = vmov (!%p678_p2), 0.0   ;;  %vm852_vm4 = vcmask (!%p678_p2), 1044480   ;;  %vm3922_vm5 = vmmov (!%p678_p2), 0   ;;  %vm3385_vm12 = vmneg (!%p678_p2), %vm834_vm0 }
   0xf   : > { %s3920_s6 = smov (!%p678_p2), 32   ;;  %s4838_s28 = sld [smem:[#allocation6_spill]] (!%p678_p2)  ;;  %v4075_v9 = vshrl.u32 (!%p678_p2), %v824_v4, 7  ;;  %3652 = vmatprep.subr.bf16.mxu1 (!%p678_p2), %v3921_v38  ;;  %3656 = vmatprep.mubr.msk.bf16.mxu1 (!%p678_p2), %vm3922_vm5, %v3921_v38  ;;  %vm863_vm6 = vcmask (!%p678_p2), 785408   ;;  %vm865_vm7 = vcmask (!%p678_p2), 523264   ;;  %vm913_vm8 = vcmask (!%p678_p2), 1043456   ;;  %vm4341_vm13 = vmpackc.low (!%p678_p2), %vm3385_vm12, %vm3385_vm12 }
  0x10   : > { %s4839_s27 = sld [smem:[#allocation2_spill]] (!%p678_p2)  ;;  %s4827_s1 = smov (!%p678_p2), 64   ;;  %vm1336_vm9 = vcmask (!%p678_p2), 517120   ;;  %vm1364_vm10 = vcmask (!%p678_p2), 1045504   ;;  %vm1366_vm11 = vcmask (!%p678_p2), 1046528   ;;  %vm2726_vm14 = vcmask (!%p678_p2), 519168  }
  0x11   : > { %v826_v17 = vsub.s32 (!%p678_p2), 0, %v4075_v9  ;;  %v831_v20 = vsub.s32 (!%p678_p2), 1, %v4075_v9  ;;  %s4841_s30 = sld [smem:[#allocation7_spill]] (!%p678_p2)  ;;  %s4842_s29 = sld [smem:[#allocation4_spill]] (!%p678_p2) }
  0x12   : > { %s4848_s5 = sld [smem:[#allocation5_spill]] (!%p678_p2) }
  0x15   : > { %s4850_s24 = smov (!%p771_p3, %s3306_s24), 3  ;;  %v3762_v5 = vld [vmem:[%s4838_s28 + $0x40] sm:$0xff]   ;;  %v3764_v7 = vld [vmem:[%s4838_s28 + $0x48] sm:$0xff]   ;;  %v3766_v10 = vld [vmem:[%s4838_s28 + $0x50] sm:$0xff]  }
  0x16   : > { %s4826_s25 = sshll.u32 %s4850_s24, 1  ;;  %v3763_v6 = vld [vmem:[%s4838_s28] sm:$0xff]   ;;  %3516 = vmatprep.subr.bf16.mxu0 %v3762_v5  ;;  %v3765_v8 = vld [vmem:[%s4838_s28 + $0x8] sm:$0xff]   ;;  %v3767_v11 = vld [vmem:[%s4838_s28 + $0x10] sm:$0xff]   ;;  %s773_s7 = scalar_lea.vmem %s4839_s27, %s4850_s24 }
  0x17   : > { %s779_s2 = scalar_lea.vmem %s4837_s26, %s4826_s25  ;;  %3517 = vmatpush3.bf16.msra.mxu0 %v3763_v6  ;;  %v3768_v12 = vld [vmem:[%s4838_s28 + $0x58] sm:$0xff]   ;;  %v3770_v14 = vld [vmem:[%s4838_s28 + $0x60] sm:$0xff]   ;;  %v3772_v30 = vld [vmem:[%s4838_s28 + $0x68] sm:$0xff]   ;;  %s3924_s26 = smov 96  }
  0x18   : > { %v3322_v0 = vld [vmem:[%s779_s2 + $0x2] sm:$0x3]  ;;  %v840_v1 = vld [vmem:[%s779_s2] sm:$0x3]  ;;  %3518 = vmatprep.subr.bf16.mxu0 %v3764_v7  ;;  %v3769_v13 = vld [vmem:[%s4838_s28 + $0x18] sm:$0xff]   ;;  %s4840_s27 = sld [smem:[#allocation8_spill]] }
  0x19   : > { %v883_v2 = vunpack.c.l.bf16 %v3322_v0  ;;  %v841_v3 = vunpack.c.l.bf16 %v840_v1  ;;  %v3771_v15 = vld [vmem:[%s4838_s28 + $0x20] sm:$0xff]   ;;  %v3773_v32 = vld [vmem:[%s4838_s28 + $0x28] sm:$0xff]   ;;  %v3775_v39 = vld [vmem:[%s4838_s28 + $0x70] sm:$0xff]   ;;  %s4201_s2 = sshll.u32 %s4850_s24, 2  ;;  %s4843_s25 = smov 64  }
  0x1a   : > { %v3321_v16 = vld [vmem:[%s773_s7 + $0x1] sm:$0x1]  ;;  %v818_v19 = vld [vmem:[%s773_s7] sm:$0x1]  ;;  %v3776_v40 = vld [vmem:[%s4838_s28 + $0x30] sm:$0xff]   ;;  %s785_s3 = scalar_lea.vmem %s4842_s29, %s4201_s2  ;;  %s4844_s7 = sld [smem:[#allocation9_spill]] }
  0x1b   : > { %885 = vrot.lane.b32.xlu0 %v883_v2, %s3920_s6  ;;  %3519 = vmatpush3.bf16.msra.mxu0 %v3765_v8  ;;  %v822_v18 = vunpack.c.l.bf16 %v3321_v16  ;;  %v819_v22 = vunpack.c.l.bf16 %v818_v19  ;;  %v3774_v35 = vld [vmem:[%s4838_s28 + $0x80] sm:$0xff]   ;;  %v3777_v44 = vld [vmem:[%s4838_s28 + $0x88] sm:$0xff]   ;;  %v3778_v46 = vld [vmem:[%s4838_s28 + $0x78] sm:$0xff]  }
  0x1c   : > { %3520 = vmatprep.subr.bf16.mxu0 %v3766_v10  ;;  %3653 = vmatpush3.bf16.msra.mxu1 %v3774_v35  ;;  %v3779_v48 = vld [vmem:[%s4838_s28 + $0x38] sm:$0xff]  }
  0x1d   : > { %v871_v21 = vrot.slane %v822_v18, %v826_v17  ;;  %v876_v23 = vrot.slane %v822_v18, %v831_v20  ;;  %v827_v25 = vrot.slane %v819_v22, %v826_v17  ;;  %v832_v27 = vrot.slane %v819_v22, %v831_v20  ;;  %3654 = vmatprep.subr.bf16.mxu1 %v3921_v38 }
  0x1e   : > { %v3784_v16 = vld [vmem:[%s4840_s27 + $0x20] sm:$0xff]   ;;  %v3785_v17 = vld [vmem:[%s4840_s27 + $0x28] sm:$0xff]   ;;  %v3787_v19 = vld [vmem:[%s4840_s27 + $0x38] sm:$0xff]  }
  0x1f   : > { %843 = vrot.lane.b32.xlu0 %v841_v3, %s3920_s6  ;;  %3521 = vmatpush3.bf16.msra.mxu0 %v3767_v11  ;;  %v878_v24 = vsel %vm834_vm0, %v822_v18, %v871_v21  ;;  %v835_v28 = vsel %vm834_vm0, %v819_v22, %v827_v25  ;;  %v3780_v11 = vld [vmem:[%s4840_s27] sm:$0xff]   ;;  %v3786_v18 = vld [vmem:[%s4840_s27 + $0x30] sm:$0xff]   ;;  %v3789_v21 = vld [vmem:[%s4840_s27 + $0x48] sm:$0xff]  }
  0x20   : > { %3522 = vmatprep.subr.bf16.mxu0 %v3768_v12  ;;  %v879_v26 = vsel %vm836_vm1, %v878_v24, %v876_v23  ;;  %v837_v31 = vsel %vm836_vm1, %v835_v28, %v832_v27  ;;  %3655 = vmatpush3.bf16.msra.mxu1 %v3777_v44  ;;  %v3925_v12 = vmov 0   ;;  %v3788_v20 = vld [vmem:[%s4840_s27 + $0x40] sm:$0xff]   ;;  %v3790_v22 = vld [vmem:[%s4840_s27 + $0x50] sm:$0xff]  }
  0x21   : > { %v880_v29 = vsel %vm838_vm2, %v879_v26, %v876_v23  ;;  %v839_v37 = vsel %vm838_vm2, %v837_v31, %v832_v27  ;;  %1294 = vmatprep.subr.bf16.mxu1 %v3925_v12  ;;  %v3323_v27 = vld [vmem:[%s4841_s30] ss:$0 sm:$0xff] }
  0x23   : > { %3523 = vmatpush3.bf16.msra.mxu0 %v3769_v13  ;;  %v3781_v13 = vld [vmem:[%s4840_s27 + $0x8] sm:$0xff]  }
  0x24   : > { %3524 = vmatprep.subr.bf16.mxu0 %v3770_v14  ;;  %v3782_v14 = vld [vmem:[%s4840_s27 + $0x10] sm:$0xff]  }
  0x27   : > { %3525 = vmatpush3.bf16.msra.mxu0 %v3771_v15  ;;  %v3783_v15 = vld [vmem:[%s4840_s27 + $0x18] sm:$0xff]  }
  0x28   : > { %3526 = vmatprep.subr.bf16.mxu0 %v3772_v30 }
  0x2b   : > { %3527 = vmatpush3.bf16.msra.mxu0 %v3773_v32 }
  0x2c   : > { %3528 = vmatprep.subr.bf16.mxu0 %v3775_v39 }
  0x2f   : > { %3529 = vmatpush3.bf16.msra.mxu0 %v3776_v40 }
  0x30   : > { %3530 = vmatprep.subr.bf16.mxu0 %v3778_v46 }
  0x33   : > { %3531 = vmatpush3.bf16.msra.mxu0 %v3779_v48 }
  0x8d   : > { %v886_v33 = vpop.permute.xlu0 %885 }
  0x8e   : > { %v888_v34 = vsel %vm846_vm3, %v880_v29, %v886_v33 }
  0x8f   : > { %v890_v36 = vrot.slane %v888_v34, 7  ;;  %v3791_v34 = vld [vmem:[%s4840_s27 + $0x58] sm:$0xff]  }
  0x91   : > { %v892_v41 = vsel %vm834_vm0, 0.0, %v890_v36  ;;  %v844_v42 = vpop.permute.xlu0 %843 }
  0x92   : > { %v847_v43 = vsel %vm846_vm3, %v839_v37, %v844_v42  ;;  %v893_v47 = vsel %vm852_vm4, %v892_v41, 0.0  ;;  %v3792_v37 = vld [vmem:[%s4808_s8 + $0x40] sm:$0xff]  }
  0x93   : > { %v849_v45 = vrot.slane %v847_v43, 7  ;;  %v895_v53 = vrot.slane %v893_v47, 1  ;;  %v899_v55 = vrot.slane %v893_v47, 2  ;;  %v1368_v41 = vld [vmem:[%s785_s3] sm:$0xff]   ;;  %3541 = vmatprep.subr.bf16.mxu0 %v3792_v37  ;;  %v3795_v43 = vld [vmem:[%s4808_s8 + $0x48] sm:$0xff]  }
  0x94   : > { %v3794_v42 = vld [vmem:[%s4808_s8] sm:$0xff]   ;;  %v1369_v46 = vunpack.c.l.bf16 %v1368_v41 }
  0x95   : > { %v851_v49 = vsel %vm834_vm0, 0.0, %v849_v45 }
  0x96   : > { %v853_v50 = vsel %vm852_vm4, %v851_v49, 0.0 }
  0x97   : > { %v859_v51 = vrot.slane %v853_v50, 2  ;;  %v855_v52 = vrot.slane %v853_v50, 1 }
  0x99   : > { %860 = vrot.lane.b32.xlu0 %v859_v51, %s4827_s1  ;;  %v3727_v54 = vpack.i.bf16 %v855_v52, %v895_v53 }
  0x9b   : > { %3728 = vrot.lane.b32.xlu1 %v3727_v54, %s3924_s26  ;;  %v3797_v54 = vld [vmem:[%s4808_s8 + $0x8] sm:$0xff]   ;;  %s791_s26 = scalar_lea.vmem %s4848_s5, %s4201_s2 }
  0x9f   : > { %900 = vrot.lane.b32.xlu1 %v899_v55, %s4827_s1  ;;  %s4845_s1 = sshll.u32 %s4850_s24, 1  ;;  %s803_s24 = scalar_lea.vmem %s4821_s21, %s4201_s2 }
  0xa0   : > { %s797_s0 = scalar_lea.vmem %s4820_s20, %s4845_s1 }
 0x10b   : > { %v861_v0 = vpop.permute.xlu0 %860 }
 0x10d   : > { %v3729_v56 = vpop.permute.xlu1 %3728 }
 0x10e   : > { %v3730_v57 = vunpack.i.l.bf16 %v3729_v56  ;;  %v3731_v58 = vunpack.i.h.bf16 %v3729_v56 }
 0x110   : > { %v903_v59 = vsel %vm863_vm6, %v893_v47, %v3730_v57  ;;  %v864_v1 = vsel %vm863_vm6, %v853_v50, %v3731_v58  ;;  %v866_v4 = vsel %vm865_vm7, %v3731_v58, %v861_v0  ;;  %v1405_v47 = vunpack.c.h.bf16 %v1368_v41 }
 0x111   : > { %v907_v60 = vrot.slane %v903_v59, 4  ;;  %v901_v61 = vpop.permute.xlu1 %900 }
 0x112   : > { %v904_v62 = vsel %vm865_vm7, %v3730_v57, %v901_v61  ;;  %v909_v63 = vrot.slane %v901_v61, 4  ;;  %v3732_v56 = vpack.i.bf16 %v1405_v47, %v1369_v46 }
 0x113   : > { %v908_v2 = vrot.slane %v904_v62, 4  ;;  %v914_v5 = vsel %vm913_vm8, %v864_v1, %v907_v60 }
 0x114   : > { %v916_v3 = vsel %vm913_vm8, %v861_v0, %v909_v63  ;;  %v917_v10 = vpack.c.bf16 %v914_v5, %v914_v5  ;;  %v3793_v0 = vld [vmem:[%s4808_s8 + $0x80] sm:$0xff]   ;;  %v3800_v5 = vld [vmem:[%s4808_s8 + $0x10] sm:$0xff]  }
 0x115   : > { %v919_v6 = vpack.c.bf16 %v916_v3, %v916_v3  ;;  %v915_v7 = vsel %vm913_vm8, %v866_v4, %v908_v2  ;;  %v3796_v2 = vld [vmem:[%s4808_s8 + $0x88] sm:$0xff]   ;;  %v3798_v3 = vld [vmem:[%s4808_s8 + $0x50] sm:$0xff]  }
 0x116   : > { %v918_v8 = vpack.c.bf16 %v915_v7, %v915_v7  ;;  %v3799_v4 = vld [vmem:[%s4808_s8 + $0x90] sm:$0xff]   ;;  %v3802_v7 = vld [vmem:[%s4808_s8 + $0x98] sm:$0xff]  }
 0x117   : > { %3657 = vmatmul.mubr.msk.bf16.vlgmr.msra.gmra.mrb[0].mxu1 %vm846_vm3, %v919_v6  ;;  %v3801_v6 = vld [vmem:[%s4808_s8 + $0x58] sm:$0xff]  }
 0x118   : > { %1106 = vmatprep.mubr.bf16.mxu0 %v918_v8  ;;  %1295 = vmatpush1.bf16.msra.mxu1 %v3780_v11  ;;  %v3803_v8 = vld [vmem:[%s4808_s8 + $0x18] sm:$0xff]   ;;  %v3805_v11 = vld [vmem:[%s4808_s8 + $0xa0] sm:$0xff]  }
 0x119   : > { %1107 = vmatmul.mubr.bf16.vlgmr.msra.gmra.mrb[0].mxu0 %v917_v10  ;;  %1296 = vmatprep.subr.bf16.mxu1 %v3925_v12  ;;  %v3804_v10 = vld [vmem:[%s4808_s8 + $0x60] sm:$0xff]  }
 0x11a   : > { %3542 = vmatpush3.bf16.msra.mxu0 %v3794_v42 }
 0x11b   : > { %3543 = vmatprep.subr.bf16.mxu0 %v3795_v43 }
 0x11c   : > { %1297 = vmatpush1.bf16.msra.mxu1 %v3781_v13  ;;  %v3806_v13 = vld [vmem:[%s4808_s8 + $0x20] sm:$0xff]  }
 0x11d   : > { %1298 = vmatprep.subr.bf16.mxu1 %v3925_v12 }
 0x11e   : > { %3544 = vmatpush3.bf16.msra.mxu0 %v3797_v54 }
 0x11f   : > { %3545 = vmatprep.subr.bf16.mxu0 %v3798_v3 }
 0x120   : > { %1299 = vmatpush1.bf16.msra.mxu1 %v3782_v14  ;;  %v3807_v14 = vld [vmem:[%s4808_s8 + $0x68] sm:$0xff]  }
 0x121   : > { %1300 = vmatprep.subr.bf16.mxu1 %v3925_v12 }
 0x122   : > { %3546 = vmatpush3.bf16.msra.mxu0 %v3800_v5 }
 0x123   : > { %3547 = vmatprep.subr.bf16.mxu0 %v3801_v6 }
 0x124   : > { %1301 = vmatpush1.bf16.msra.mxu1 %v3783_v15  ;;  %v3808_v15 = vld [vmem:[%s4808_s8 + $0xa8] sm:$0xff]  }
 0x125   : > { %1302 = vmatprep.subr.bf16.mxu1 %v3925_v12 }
 0x126   : > { %3548 = vmatpush3.bf16.msra.mxu0 %v3803_v8 }
 0x127   : > { %3549 = vmatprep.subr.bf16.mxu0 %v3804_v10 }
 0x128   : > { %1303 = vmatpush1.bf16.msra.mxu1 %v3784_v16  ;;  %v3809_v16 = vld [vmem:[%s4808_s8 + $0x28] sm:$0xff]  }
 0x129   : > { %1304 = vmatprep.subr.bf16.mxu1 %v3925_v12 }
 0x12a   : > { %3550 = vmatpush3.bf16.msra.mxu0 %v3806_v13 }
 0x12b   : > { %3551 = vmatprep.subr.bf16.mxu0 %v3807_v14 }
 0x12c   : > { %1305 = vmatpush1.bf16.msra.mxu1 %v3785_v17  ;;  %v3810_v17 = vld [vmem:[%s4808_s8 + $0x70] sm:$0xff]  }
 0x12d   : > { %1306 = vmatprep.subr.bf16.mxu1 %v3925_v12 }
 0x12e   : > { %3552 = vmatpush3.bf16.msra.mxu0 %v3809_v16 }
 0x12f   : > { %3553 = vmatprep.subr.bf16.mxu0 %v3810_v17 }
 0x130   : > { %1307 = vmatpush1.bf16.msra.mxu1 %v3786_v18  ;;  %v3811_v18 = vld [vmem:[%s4808_s8 + $0xb0] sm:$0xff]  }
 0x131   : > { %1308 = vmatprep.subr.bf16.mxu1 %v3925_v12 }
 0x134   : > { %1309 = vmatpush1.bf16.msra.mxu1 %v3787_v19  ;;  %v3812_v19 = vld [vmem:[%s4808_s8 + $0x30] sm:$0xff]  }
 0x135   : > { %1310 = vmatprep.subr.bf16.mxu1 %v3925_v12  ;;  %3554 = vmatpush3.bf16.msra.mxu0 %v3812_v19 }
 0x138   : > { %1311 = vmatpush1.bf16.msra.mxu1 %v3788_v20  ;;  %v3813_v20 = vld [vmem:[%s4808_s8 + $0x78] sm:$0xff]  }
 0x139   : > { %1312 = vmatprep.subr.bf16.mxu1 %v3925_v12  ;;  %3555 = vmatprep.subr.bf16.mxu0 %v3813_v20 }
 0x13c   : > { %1313 = vmatpush1.bf16.msra.mxu1 %v3789_v21  ;;  %v3814_v21 = vld [vmem:[%s4808_s8 + $0xb8] sm:$0xff]  }
 0x13d   : > { %1314 = vmatprep.subr.bf16.mxu1 %v3925_v12 }
 0x140   : > { %1315 = vmatpush1.bf16.msra.mxu1 %v3790_v22  ;;  %v3815_v22 = vld [vmem:[%s4808_s8 + $0x38] sm:$0xff]  }
 0x141   : > { %1316 = vmatprep.subr.bf16.mxu1 %v3925_v12  ;;  %3556 = vmatpush3.bf16.msra.mxu0 %v3815_v22  ;;  %v3817_v22 = vld [vmem:[%s4810_s10 + $0x80] sm:$0xff]  }
 0x144   : > { %1317 = vmatpush1.bf16.msra.mxu1 %v3791_v34 }
 0x145   : > { %3660 = vmatprep.subr.bf16.mxu1 %v3921_v38 }
 0x1ea   : > { %v1148_v23 = vpop.f32.mrb[0].mxu1 }
 0x1eb   : > { %v3658_v24 = vpop.f32.mrb[1].mxu1 }
 0x1ec   : > { %v3532_v25 = vpop.f32.mrb[0].mxu0  ;;  %v1151_v26 = vpop.f32.mrb[2].mxu1  ;;  %v3926_v24 = vmov 1983009808  }
 0x1ed   : > { %v3533_v28 = vpop.f32.mrb[1].mxu0  ;;  %v3659_v29 = vpop.f32.mrb[3].mxu1  ;;  %v3344_v26 = vld [vmem:[%s4844_s7] ss:$0 sm:$0xff] }
 0x1ee   : > { %v3534_v30 = vadd.f32 %v3533_v28, %v3532_v25  ;;  %v3535_v31 = vpop.f32.mrb[2].mxu0  ;;  %v1340_v25 = vunpack.c.l.s4 %v3926_v24 }
 0x1ef   : > { %v3536_v32 = vpop.f32.mrb[3].mxu0 }
 0x1f0   : > { %v1109_v33 = vadd.f32 %v3534_v30, %v3323_v27  ;;  %v1341_v27 = vunpack.c.0.s8 %v1340_v25 }
 0x1f2   : > { %v1149_v35 = vadd.f32 %v1148_v23, %v1109_v33  ;;  %v3816_v23 = vld [vmem:[%s4810_s10 + $0x40] sm:$0xff]   ;;  %v1344_v32 = vsub.s32 %v1341_v27, %v4075_v9  ;;  %v3820_v27 = vld [vmem:[%s4810_s10 + $0x88] sm:$0xff]  }
 0x1f3   : > { %3572 = vmatprep.subr.bf16.mxu0 %v3816_v23  ;;  %v3818_v23 = vld [vmem:[%s4810_s10] sm:$0xff]  }
 0x1f4   : > { %v1154_v36 = vmax.f32 %v1149_v35, 0.0 }
 0x1f6   : > { %v1156_v39 = vrot.slane %v1154_v36, 7  ;;  %v1168_v40 = vrot.slane %v1154_v36, 3 }
 0x1f8   : > { %v1170_v44 = vsel %vm834_vm0, 0.0, %v1168_v40  ;;  %v1158_v45 = vsel %vm834_vm0, 0.0, %v1156_v39 }
 0x1f9   : > { %v1171_v48 = vsel %vm852_vm4, %v1170_v44, 0.0  ;;  %v1159_v49 = vsel %vm852_vm4, %v1158_v45, 0.0 }
 0x1fa   : > { %v1173_v50 = vrot.slane %v1171_v48, 1  ;;  %v3343_v51 = vrot.slane %v1171_v48, 6  ;;  %v1161_v52 = vrot.slane %v1159_v49, 1  ;;  %v1165_v53 = vrot.slane %v1159_v49, 2 }
 0x1fc   : > { %1174 = vrot.lane.b32.xlu1 %v1173_v50, %s4843_s25  ;;  %1162 = vrot.lane.b32.xlu0 %v1161_v52, %s4843_s25  ;;  %v1185_v55 = vsel %vm913_vm8, %v1165_v53, %v3343_v51 }
 0x1fd   : > { %v1187_v57 = vpack.c.bf16 %v1185_v55, %v1185_v55 }
 0x1ff   : > { %3357 = vmatprep.mubr.msk.bf16.mxu1 %vm865_vm7, %v1187_v57 }
 0x200   : > { %3733 = vrot.lane.b32.xlu1 %v3732_v56, %s4843_s25 }
 0x26e   : > { %v1175_v58 = vpop.permute.xlu1 %1174  ;;  %v1163_v59 = vpop.permute.xlu0 %1162 }
 0x26f   : > { %v1178_v60 = vsel %vm865_vm7, %v1171_v48, %v1175_v58  ;;  %v1167_v62 = vsel %vm865_vm7, %v1159_v49, %v1163_v59 }
 0x270   : > { %v1180_v61 = vrot.slane %v1178_v60, 4 }
 0x272   : > { %v1184_v63 = vsel %vm913_vm8, %v1167_v62, %v1180_v61  ;;  %v3734_v41 = vpop.permute.xlu1 %3733 }
 0x273   : > { %v1186_v1 = vpack.c.bf16 %v1184_v63, %v1184_v63  ;;  %v3735_v50 = vunpack.i.l.bf16 %v3734_v41  ;;  %v3736_v54 = vunpack.i.h.bf16 %v3734_v41  ;;  %v3833_v41 = vld [vmem:[%s4810_s10 + $0x28] sm:$0xff]  }
 0x275   : > { %1327 = vmatmul.mubr.bf16.vlgmr.msra.gmra.mrb[4].mxu1 %v1186_v1 }
 0x276   : > { %3661 = vmatpush3.bf16.msra.mxu1 %v3793_v0  ;;  %3676 = vmatprep.mubr.msk.bf16.mxu1 %vm3922_vm5, %v3921_v38 }
 0x277   : > { %3662 = vmatprep.subr.bf16.mxu1 %v3921_v38 }
 0x27a   : > { %3663 = vmatpush3.bf16.msra.mxu1 %v3796_v2 }
 0x27b   : > { %3664 = vmatprep.subr.bf16.mxu1 %v3921_v38 }
 0x27e   : > { %3665 = vmatpush3.bf16.msra.mxu1 %v3799_v4 }
 0x27f   : > { %3666 = vmatprep.subr.bf16.mxu1 %v3921_v38 }
 0x282   : > { %3667 = vmatpush3.bf16.msra.mxu1 %v3802_v7 }
 0x283   : > { %3668 = vmatprep.subr.bf16.mxu1 %v3921_v38 }
 0x286   : > { %3669 = vmatpush3.bf16.msra.mxu1 %v3805_v11 }
 0x287   : > { %3670 = vmatprep.subr.bf16.mxu1 %v3921_v38 }
 0x28a   : > { %3671 = vmatpush3.bf16.msra.mxu1 %v3808_v15 }
 0x28b   : > { %3672 = vmatprep.subr.bf16.mxu1 %v3921_v38 }
 0x28e   : > { %3673 = vmatpush3.bf16.msra.mxu1 %v3811_v18 }
 0x28f   : > { %3674 = vmatprep.subr.bf16.mxu1 %v3921_v38 }
 0x292   : > { %3675 = vmatpush3.bf16.msra.mxu1 %v3814_v21  ;;  %v3875_v21 = vld [vmem:[%s4812_s12 + $0x118] sm:$0xff]  }
 0x293   : > { %3680 = vmatprep.subr.bf16.mxu1 %v3921_v38 }
 0x348   : > { %v1328_v28 = vpop.f32.mrb[4].mxu1 }
 0x349   : > { %v1329_v29 = vadd.f32 %v3344_v26, %v1328_v28  ;;  %v1330_v30 = vpop.f32.mrb[5].mxu1  ;;  %v3819_v26 = vld [vmem:[%s4810_s10 + $0x48] sm:$0xff]  }
 0x34a   : > { %v1331_v31 = vpop.f32.mrb[6].mxu1  ;;  %v3821_v28 = vld [vmem:[%s4810_s10 + $0x8] sm:$0xff]   ;;  %v3823_v30 = vld [vmem:[%s4810_s10 + $0x90] sm:$0xff]  }
 0x34b   : > { %v1334_v33 = vmax.f32 %v1329_v29, 0.0  ;;  %v1332_v34 = vpop.f32.mrb[7].mxu1  ;;  %v3822_v29 = vld [vmem:[%s4810_s10 + $0x50] sm:$0xff]  }
 0x34c   : > { %v3824_v31 = vld [vmem:[%s4810_s10 + $0x10] sm:$0xff]   ;;  %v3827_v34 = vld [vmem:[%s4810_s10 + $0x18] sm:$0xff]  }
 0x34d   : > { %v1335_v35 = vpack.c.bf16 %v1334_v33, %v1334_v33  ;;  %v1351_v36 = vrot.slane %v1334_v33, 7  ;;  %v1357_v37 = vrot.slane %v1334_v33, 4  ;;  %v1390_v39 = vrot.slane %v1334_v33, 3 }
 0x34e   : > { %v1353_v42 = vrot.slane %v1334_v33, 6  ;;  %v1392_v44 = vrot.slane %v1334_v33, 2  ;;  %v1355_v47 = vrot.slane %v1334_v33, 5  ;;  %v1394_v52 = vrot.slane %v1334_v33, 1 }
 0x34f   : > { %1337 = vst.msk [vmem:[%s797_s0] sm:$0x3] %vm1336_vm9, %v1335_v35  ;;  %v1345_v40 = vrot.slane %v1335_v35, %v1344_v32  ;;  %v1359_v9 = vsel %vm834_vm0, %v1334_v33, %v1351_v36  ;;  %v1396_v45 = vsel %vm834_vm0, %v1357_v37, %v1390_v39  ;;  %v3825_v32 = vld [vmem:[%s4810_s10 + $0x58] sm:$0xff]   ;;  %v3828_v35 = vld [vmem:[%s4810_s10 + $0x60] sm:$0xff]  }
 0x350   : > { %v1360_v43 = vsel %vm836_vm1, %v1359_v9, %v1351_v36  ;;  %v1397_v49 = vsel %vm836_vm1, %v1396_v45, %v1390_v39  ;;  %v3829_v36 = vld [vmem:[%s4810_s10 + $0xa0] sm:$0xff]   ;;  %v3831_v39 = vld [vmem:[%s4810_s10 + $0x68] sm:$0xff]   ;;  %v3835_v9 = vld [vmem:[%s4810_s10 + $0xb0] sm:$0xff]  }
 0x351   : > { %v1346_v46 = vcombine.high %v1345_v40, %v1345_v40  ;;  %v1361_v48 = vsel %vm838_vm2, %v1360_v43, %v1353_v42  ;;  %v1398_v53 = vsel %vm838_vm2, %v1397_v49, %v1392_v44  ;;  %v3832_v40 = vld [vmem:[%s4810_s10 + $0xa8] sm:$0xff]   ;;  %v3836_v43 = vld [vmem:[%s4810_s10 + $0x30] sm:$0xff]   ;;  %v3838_v45 = vld [vmem:[%s4810_s10 + $0xb8] sm:$0xff]  }
 0x352   : > { %v1362_v51 = vsel %vm913_vm8, %v1361_v48, %v1353_v42  ;;  %v1399_v56 = vsel %vm913_vm8, %v1398_v53, %v1392_v44  ;;  %v3834_v42 = vld [vmem:[%s4810_s10 + $0x70] sm:$0xff]   ;;  %v3837_v44 = vld [vmem:[%s4810_s10 + $0x78] sm:$0xff]  }
 0x353   : > { %3358 = vst.msk [vmem:[%s797_s0 + $0x2] sm:$0x3] %vm1336_vm9, %v1346_v46  ;;  %v1363_v55 = vsel %vm852_vm4, %v1362_v51, %v1355_v47  ;;  %v1400_v58 = vsel %vm852_vm4, %v1399_v56, %v1394_v52  ;;  %v3839_v46 = vld [vmem:[%s4810_s10 + $0x38] sm:$0xff]  }
 0x354   : > { %v1365_v57 = vsel %vm1364_vm10, %v1363_v55, %v1355_v47  ;;  %v1401_v60 = vsel %vm1364_vm10, %v1400_v58, %v1394_v52 }
 0x355   : > { %v1367_v59 = vsel %vm1366_vm11, %v1365_v57, %v1357_v37  ;;  %v1402_v62 = vsel %vm1366_vm11, %v1401_v60, %v1334_v33  ;;  %v3826_v33 = vld [vmem:[%s4810_s10 + $0x98] sm:$0xff]   ;;  %v3830_v37 = vld [vmem:[%s4810_s10 + $0x20] sm:$0xff]  }
 0x356   : > { %v1374_v61 = vsel %vm865_vm7, %v1367_v59, %v3735_v50  ;;  %v1410_v0 = vsel %vm865_vm7, %v1402_v62, %v3736_v54  ;;  %v3360_v50 = vld [vmem:[%s4809_s9] ss:$0 sm:$0xff] }
 0x357   : > { %v1376_v63 = vrot.slane %v1374_v61, 7  ;;  %v1412_v1 = vrot.slane %v1410_v0, 7 }
 0x359   : > { %v1378_v2 = vsel %vm834_vm0, 0.0, %v1376_v63  ;;  %v1379_v3 = vsel %vm834_vm0, %v1376_v63, 0.0  ;;  %v1414_v8 = vsel %vm834_vm0, 0.0, %v1412_v1  ;;  %v1415_v10 = vsel %vm834_vm0, %v1412_v1, 0.0 }
 0x35a   : > { %v1382_v4 = vrot.slane %v1378_v2, 1  ;;  %v1383_v5 = vrot.slane %v1379_v3, 1  ;;  %v1386_v6 = vrot.slane %v1378_v2, 2  ;;  %v1387_v7 = vrot.slane %v1379_v3, 2 }
 0x35b   : > { %v1418_v13 = vrot.slane %v1414_v8, 1  ;;  %v1419_v14 = vrot.slane %v1415_v10, 1  ;;  %v1422_v15 = vrot.slane %v1414_v8, 2  ;;  %v1423_v16 = vrot.slane %v1415_v10, 2 }
 0x35c   : > { %v1384_v11 = vsel %vm1366_vm11, %v1382_v4, %v1383_v5  ;;  %v1388_v17 = vsel %vm1364_vm10, %v1386_v6, %v1387_v7  ;;  %v3388_v24 = vpack.c.bf16 %v1412_v1, %v1376_v63 }
 0x35d   : > { %v1420_v18 = vsel %vm1366_vm11, %v1418_v13, %v1419_v14  ;;  %v1424_v20 = vsel %vm1364_vm10, %v1422_v15, %v1423_v16 }
 0x35e   : > { %v1427_v19 = vpack.c.bf16 %v1420_v18, %v1384_v11  ;;  %v1428_v25 = vpack.c.bf16 %v1424_v20, %v1388_v17 }
 0x360   : > { %1660 = vmatprep.mubr.bf16.mxu0 %v1427_v19  ;;  %3677 = vmatmul.mubr.bf16.vlgmr.msra.gmra.mrb[8].mxu1 %v1428_v25  ;;  %v3841_v25 = vld [vmem:[%s4812_s12 + $0x80] sm:$0xff]  }
 0x361   : > { %3389 = vmatmul.mubr.msk.bf16.vlgmr.msra.gmra.mrb[4].mxu0 %vm4341_vm13, %v3388_v24  ;;  %3681 = vmatpush3.bf16.msra.mxu1 %v3817_v22  ;;  %v3840_v24 = vld [vmem:[%s4812_s12 + $0xc0] sm:$0xff]  }
 0x362   : > { %3573 = vmatpush3.bf16.msra.mxu0 %v3818_v23  ;;  %3682 = vmatprep.subr.bf16.mxu1 %v3921_v38 }
 0x363   : > { %3574 = vmatprep.subr.bf16.mxu0 %v3819_v26  ;;  %3696 = vmatprep.mubr.msk.bf16.mxu1 %vm3922_vm5, %v3921_v38  ;;  %v3842_v26 = vld [vmem:[%s4812_s12 + $0x40] sm:$0xff]  }
 0x365   : > { %3683 = vmatpush3.bf16.msra.mxu1 %v3820_v27  ;;  %v3843_v27 = vld [vmem:[%s4812_s12] sm:$0xff]  }
 0x366   : > { %3575 = vmatpush3.bf16.msra.mxu0 %v3821_v28  ;;  %3684 = vmatprep.subr.bf16.mxu1 %v3921_v38  ;;  %v3844_v28 = vld [vmem:[%s4812_s12 + $0xc8] sm:$0xff]  }
 0x367   : > { %3576 = vmatprep.subr.bf16.mxu0 %v3822_v29  ;;  %v3846_v29 = vld [vmem:[%s4812_s12 + $0x48] sm:$0xff]  }
 0x369   : > { %3685 = vmatpush3.bf16.msra.mxu1 %v3823_v30  ;;  %v3845_v30 = vld [vmem:[%s4812_s12 + $0x88] sm:$0xff]  }
 0x36a   : > { %3577 = vmatpush3.bf16.msra.mxu0 %v3824_v31  ;;  %3686 = vmatprep.subr.bf16.mxu1 %v3921_v38  ;;  %v3847_v31 = vld [vmem:[%s4812_s12 + $0x8] sm:$0xff]  }
 0x36b   : > { %3578 = vmatprep.subr.bf16.mxu0 %v3825_v32  ;;  %v3848_v32 = vld [vmem:[%s4812_s12 + $0xd0] sm:$0xff]  }
 0x36d   : > { %3687 = vmatpush3.bf16.msra.mxu1 %v3826_v33  ;;  %v3850_v33 = vld [vmem:[%s4812_s12 + $0x50] sm:$0xff]  }
 0x36e   : > { %3579 = vmatpush3.bf16.msra.mxu0 %v3827_v34  ;;  %3688 = vmatprep.subr.bf16.mxu1 %v3921_v38  ;;  %v3849_v34 = vld [vmem:[%s4812_s12 + $0x90] sm:$0xff]  }
 0x36f   : > { %3580 = vmatprep.subr.bf16.mxu0 %v3828_v35  ;;  %v3851_v35 = vld [vmem:[%s4812_s12 + $0x10] sm:$0xff]  }
 0x371   : > { %3689 = vmatpush3.bf16.msra.mxu1 %v3829_v36  ;;  %v3852_v36 = vld [vmem:[%s4812_s12 + $0xd8] sm:$0xff]  }
 0x372   : > { %3581 = vmatpush3.bf16.msra.mxu0 %v3830_v37  ;;  %3690 = vmatprep.subr.bf16.mxu1 %v3921_v38  ;;  %v3854_v37 = vld [vmem:[%s4812_s12 + $0x58] sm:$0xff]  }
 0x373   : > { %3582 = vmatprep.subr.bf16.mxu0 %v3831_v39  ;;  %v3853_v39 = vld [vmem:[%s4812_s12 + $0x98] sm:$0xff]  }
 0x375   : > { %3691 = vmatpush3.bf16.msra.mxu1 %v3832_v40  ;;  %v3855_v40 = vld [vmem:[%s4812_s12 + $0x18] sm:$0xff]  }
 0x376   : > { %3583 = vmatpush3.bf16.msra.mxu0 %v3833_v41  ;;  %3692 = vmatprep.subr.bf16.mxu1 %v3921_v38  ;;  %v3856_v41 = vld [vmem:[%s4812_s12 + $0xe0] sm:$0xff]  }
 0x377   : > { %3584 = vmatprep.subr.bf16.mxu0 %v3834_v42  ;;  %v3858_v42 = vld [vmem:[%s4812_s12 + $0x60] sm:$0xff]  }
 0x379   : > { %3693 = vmatpush3.bf16.msra.mxu1 %v3835_v9  ;;  %v3857_v9 = vld [vmem:[%s4812_s12 + $0xa0] sm:$0xff]  }
 0x37a   : > { %3585 = vmatpush3.bf16.msra.mxu0 %v3836_v43  ;;  %3694 = vmatprep.subr.bf16.mxu1 %v3921_v38  ;;  %v3859_v43 = vld [vmem:[%s4812_s12 + $0x20] sm:$0xff]  }
 0x37b   : > { %3586 = vmatprep.subr.bf16.mxu0 %v3837_v44  ;;  %v3860_v44 = vld [vmem:[%s4812_s12 + $0xe8] sm:$0xff]  }
 0x37d   : > { %3695 = vmatpush3.bf16.msra.mxu1 %v3838_v45  ;;  %v3862_v45 = vld [vmem:[%s4812_s12 + $0x68] sm:$0xff]  }
 0x37e   : > { %3587 = vmatpush3.bf16.msra.mxu0 %v3839_v46  ;;  %3625 = vmatprep.subr.bf16.mxu1 %v3840_v24  ;;  %v3861_v46 = vld [vmem:[%s4812_s12 + $0xa8] sm:$0xff]  }
 0x37f   : > { %3603 = vmatprep.subr.bf16.mxu0 %v3842_v26 }
 0x433   : > { %v1703_v47 = vpop.f32.mrb[8].mxu1 }
 0x434   : > { %v3557_v48 = vpop.f32.mrb[4].mxu0  ;;  %v3678_v49 = vpop.f32.mrb[9].mxu1 }
 0x435   : > { %v3558_v51 = vpop.f32.mrb[5].mxu0  ;;  %v1706_v53 = vpop.f32.mrb[10].mxu1  ;;  %v3865_v49 = vld [vmem:[%s4812_s12 + $0xb0] sm:$0xff]  }
 0x436   : > { %v3559_v52 = vadd.f32 %v3558_v51, %v3557_v48  ;;  %v3560_v54 = vpop.f32.mrb[6].mxu0  ;;  %v3679_v55 = vpop.f32.mrb[11].mxu1  ;;  %v3864_v48 = vld [vmem:[%s4812_s12 + $0xf0] sm:$0xff]  }
 0x437   : > { %v3561_v56 = vpop.f32.mrb[7].mxu0 }
 0x438   : > { %v1663_v57 = vadd.f32 %v3559_v52, %v3360_v50  ;;  %v3562_v58 = vadd.f32 %v3561_v56, %v3560_v54 }
 0x43a   : > { %v1704_v59 = vadd.f32 %v1703_v47, %v1663_v57  ;;  %v1666_v60 = vadd.f32 %v3562_v58, %v3360_v50  ;;  %v3863_v47 = vld [vmem:[%s4812_s12 + $0x28] sm:$0xff]   ;;  %v2033_v50 = vld [vmem:[%s791_s26] sm:$0xff]   ;;  %s809_s26 = scalar_lea.vmem %s4822_s22, %s4201_s2 }
 0x43b   : > { %v2034_v52 = vunpack.c.l.bf16 %v2033_v50  ;;  %v2073_v56 = vunpack.c.h.bf16 %v2033_v50  ;;  %v3390_v57 = vld [vmem:[%s4811_s11] ss:$0 sm:$0xff] }
 0x43c   : > { %v1710_v61 = vmax.f32 %v1704_v59, 0.0  ;;  %v1707_v62 = vadd.f32 %v1706_v53, %v1666_v60 }
 0x43e   : > { %v1713_v63 = vrot.slane %v1710_v61, 7  ;;  %v1711_v0 = vmax.f32 %v1707_v62, 0.0  ;;  %v2038_v62 = vrot.slane %v2034_v52, 7 }
 0x440   : > { %v1715_v1 = vsel %vm834_vm0, 0.0, %v1713_v63  ;;  %v1716_v2 = vsel %vm834_vm0, %v1713_v63, 0.0  ;;  %v1728_v3 = vrot.slane %v1711_v0, 7 }
 0x441   : > { %v1723_v4 = vrot.slane %v1715_v1, 2  ;;  %v1724_v5 = vrot.slane %v1716_v2, 2  ;;  %v1719_v6 = vrot.slane %v1715_v1, 1  ;;  %v1720_v11 = vrot.slane %v1716_v2, 1 }
 0x442   : > { %v1730_v7 = vsel %vm834_vm0, 0.0, %v1728_v3  ;;  %v1731_v8 = vsel %vm834_vm0, %v1728_v3, 0.0  ;;  %v3418_v10 = vpack.c.bf16 %v1728_v3, %v1713_v63  ;;  %v2077_v2 = vrot.slane %v2073_v56, 7  ;;  %v3866_v3 = vld [vmem:[%s4812_s12 + $0x70] sm:$0xff]  }
 0x443   : > { %v1738_v13 = vrot.slane %v1730_v7, 2  ;;  %v1739_v14 = vrot.slane %v1731_v8, 2  ;;  %v1734_v15 = vrot.slane %v1730_v7, 1  ;;  %v1735_v16 = vrot.slane %v1731_v8, 1 }
 0x444   : > { %v1725_v17 = vsel %vm1364_vm10, %v1723_v4, %v1724_v5  ;;  %v1721_v19 = vsel %vm1366_vm11, %v1719_v6, %v1720_v11  ;;  %v3867_v4 = vld [vmem:[%s4812_s12 + $0x30] sm:$0xff]   ;;  %v4530_v7 = vsel %vm834_vm0, 0.0, %v2038_v62  ;;  %v2044_v8 = vsel %vm834_vm0, %v2038_v62, 0.0  ;;  %v3869_v11 = vld [vmem:[%s4812_s12 + $0xb8] sm:$0xff]  }
 0x445   : > { %v1740_v18 = vsel %vm1364_vm10, %v1738_v13, %v1739_v14  ;;  %v1736_v20 = vsel %vm1366_vm11, %v1734_v15, %v1735_v16  ;;  %v2081_v15 = vsel %vm834_vm0, 0.0, %v2077_v2  ;;  %v2083_v16 = vsel %vm834_vm0, %v2077_v2, 0.0 }
 0x446   : > { %v1744_v22 = vpack.c.bf16 %v1740_v18, %v1725_v17  ;;  %v1743_v23 = vpack.c.bf16 %v1736_v20, %v1721_v19  ;;  %v3870_v17 = vld [vmem:[%s4812_s12 + $0x78] sm:$0xff]   ;;  %v2052_v18 = vrot.slane %v4530_v7, 1  ;;  %v2053_v19 = vrot.slane %v2044_v8, 1 }
 0x447   : > { %v3871_v20 = vld [vmem:[%s4812_s12 + $0x38] sm:$0xff]   ;;  %v2091_v24 = vrot.slane %v2081_v15, 1  ;;  %v2065_v50 = vrot.slane %v4530_v7, 2  ;;  %v2104_v52 = vrot.slane %v2081_v15, 2 }
 0x448   : > { %3697 = vmatmul.mubr.bf16.vlgmr.msra.gmra.mrb[12].mxu1 %v1744_v22  ;;  %1976 = vmatprep.mubr.bf16.mxu0 %v1743_v23 }
 0x449   : > { %3419 = vmatmul.mubr.msk.bf16.vlgmr.msra.gmra.mrb[8].mxu0 %vm4341_vm13, %v3418_v10  ;;  %3626 = vmatpush3.bf16.msra.mxu1 %v3841_v25  ;;  %v3868_v10 = vld [vmem:[%s4812_s12 + $0xf8] sm:$0xff]   ;;  %v2092_v25 = vrot.slane %v2083_v16, 1 }
 0x44a   : > { %3604 = vmatpush3.bf16.msra.mxu0 %v3843_v27  ;;  %3627 = vmatprep.subr.bf16.mxu1 %v3844_v28 }
 0x44b   : > { %3605 = vmatprep.subr.bf16.mxu0 %v3846_v29 }
 0x44d   : > { %3628 = vmatpush3.bf16.msra.mxu1 %v3845_v30 }
 0x44e   : > { %3606 = vmatpush3.bf16.msra.mxu0 %v3847_v31  ;;  %3629 = vmatprep.subr.bf16.mxu1 %v3848_v32  ;;  %v2054_v32 = vsel %vm1366_vm11, %v2052_v18, %v2053_v19  ;;  %v3885_v18 = vld [vmem:[%s4814_s14 + $0x48] sm:$0xff]   ;;  %v3886_v19 = vld [vmem:[%s4814_s14 + $0x50] sm:$0xff]  }
 0x44f   : > { %3607 = vmatprep.subr.bf16.mxu0 %v3850_v33 }
 0x451   : > { %3630 = vmatpush3.bf16.msra.mxu1 %v3849_v34 }
 0x452   : > { %3608 = vmatpush3.bf16.msra.mxu0 %v3851_v35  ;;  %3631 = vmatprep.subr.bf16.mxu1 %v3852_v36 }
 0x453   : > { %3609 = vmatprep.subr.bf16.mxu0 %v3854_v37 }
 0x455   : > { %3632 = vmatpush3.bf16.msra.mxu1 %v3853_v39 }
 0x456   : > { %3610 = vmatpush3.bf16.msra.mxu0 %v3855_v40  ;;  %3633 = vmatprep.subr.bf16.mxu1 %v3856_v41 }
 0x457   : > { %3611 = vmatprep.subr.bf16.mxu0 %v3858_v42  ;;  %v2093_v42 = vsel %vm1366_vm11, %v2091_v24, %v2092_v25  ;;  %v3422_v25 = vld [vmem:[%s4813_s13] ss:$0 sm:$0xff] }
 0x459   : > { %3634 = vmatpush3.bf16.msra.mxu1 %v3857_v9 }
 0x45a   : > { %3612 = vmatpush3.bf16.msra.mxu0 %v3859_v43  ;;  %3635 = vmatprep.subr.bf16.mxu1 %v3860_v44 }
 0x45b   : > { %3613 = vmatprep.subr.bf16.mxu0 %v3862_v45 }
 0x45d   : > { %3636 = vmatpush3.bf16.msra.mxu1 %v3861_v46 }
 0x45e   : > { %3614 = vmatpush3.bf16.msra.mxu0 %v3863_v47  ;;  %3637 = vmatprep.subr.bf16.mxu1 %v3864_v48 }
 0x45f   : > { %3615 = vmatprep.subr.bf16.mxu0 %v3866_v3  ;;  %v3872_v3 = vld [vmem:[%s4812_s12 + $0x100] sm:$0xff]  }
 0x461   : > { %3638 = vmatpush3.bf16.msra.mxu1 %v3865_v49 }
 0x462   : > { %3616 = vmatpush3.bf16.msra.mxu0 %v3867_v4  ;;  %3639 = vmatprep.subr.bf16.mxu1 %v3868_v10  ;;  %v3877_v10 = vld [vmem:[%s4814_s14 + $0x8] sm:$0xff]  }
 0x463   : > { %3617 = vmatprep.subr.bf16.mxu0 %v3870_v17  ;;  %v3884_v17 = vld [vmem:[%s4814_s14 + $0x40] sm:$0xff]  }
 0x465   : > { %3640 = vmatpush3.bf16.msra.mxu1 %v3869_v11  ;;  %v3879_v11 = vld [vmem:[%s4814_s14 + $0x18] sm:$0xff]  }
 0x466   : > { %3700 = vmatprep.subr.bf16.mxu1 %v3921_v38  ;;  %3618 = vmatpush3.bf16.msra.mxu0 %v3871_v20 }
 0x467   : > { %2682 = vmatprep.subr.bf16.mxu0 %v3925_v12 }
 0x51b   : > { %v2019_v51 = vpop.f32.mrb[12].mxu1 }
 0x51c   : > { %v3698_v53 = vpop.f32.mrb[13].mxu1  ;;  %v3588_v54 = vpop.f32.mrb[8].mxu0 }
 0x51d   : > { %v2022_v55 = vpop.f32.mrb[14].mxu1  ;;  %v3589_v58 = vpop.f32.mrb[9].mxu0  ;;  %v2105_v53 = vrot.slane %v2083_v16, 2  ;;  %v3883_v16 = vld [vmem:[%s4814_s14 + $0x38] sm:$0xff]  }
 0x51e   : > { %v3699_v59 = vpop.f32.mrb[15].mxu1  ;;  %v3590_v60 = vadd.f32 %v3589_v58, %v3588_v54  ;;  %v3591_v61 = vpop.f32.mrb[10].mxu0 }
 0x51f   : > { %v3592_v63 = vpop.f32.mrb[11].mxu0 }
 0x520   : > { %v1979_v0 = vadd.f32 %v3590_v60, %v3390_v57  ;;  %v3593_v1 = vadd.f32 %v3592_v63, %v3591_v61 }
 0x522   : > { %v2020_v5 = vadd.f32 %v2019_v51, %v1979_v0  ;;  %v1982_v6 = vadd.f32 %v3593_v1, %v3390_v57  ;;  %v2066_v51 = vrot.slane %v2044_v8, 2  ;;  %v3876_v8 = vld [vmem:[%s4814_s14] sm:$0xff]  }
 0x524   : > { %v2026_v13 = vmax.f32 %v2020_v5, 0.0  ;;  %v2023_v14 = vadd.f32 %v2022_v55, %v1982_v6  ;;  %v2067_v54 = vsel %vm1364_vm10, %v2065_v50, %v2066_v51  ;;  %v2106_v55 = vsel %vm1364_vm10, %v2104_v52, %v2105_v53  ;;  %v3873_v6 = vld [vmem:[%s4812_s12 + $0x108] sm:$0xff]  }
 0x525   : > { %v2114_v56 = vpack.c.bf16 %v2106_v55, %v2067_v54 }
 0x526   : > { %v2037_v22 = vrot.slane %v2026_v13, 7  ;;  %v2027_v23 = vmax.f32 %v2023_v14, 0.0  ;;  %v3881_v14 = vld [vmem:[%s4814_s14 + $0x28] sm:$0xff]  }
 0x528   : > { %v3514_v26 = vpack.c.bf16 %v2027_v23, %v2026_v13  ;;  %v2076_v27 = vrot.slane %v2027_v23, 7  ;;  %v2041_v28 = vsel %vm834_vm0, 0.0, %v2037_v22  ;;  %v2043_v29 = vsel %vm834_vm0, %v2037_v22, 0.0  ;;  %v3880_v13 = vld [vmem:[%s4814_s14 + $0x20] sm:$0xff]  }
 0x529   : > { %v2049_v30 = vrot.slane %v2041_v28, 1  ;;  %v2050_v31 = vrot.slane %v2043_v29, 1  ;;  %v2062_v33 = vrot.slane %v2041_v28, 2  ;;  %v2063_v37 = vrot.slane %v2043_v29, 2 }
 0x52a   : > { %3515 = vst [vmem:[%s803_s24] sm:$0xff] %v3514_v26   ;;  %v3462_v34 = vpack.c.bf16 %v2076_v27, %v2037_v22  ;;  %v2080_v35 = vsel %vm834_vm0, 0.0, %v2076_v27  ;;  %v2082_v36 = vsel %vm834_vm0, %v2076_v27, 0.0 }
 0x52b   : > { %v2051_v39 = vsel %vm1366_vm11, %v2049_v30, %v2050_v31  ;;  %v2088_v40 = vrot.slane %v2080_v35, 1  ;;  %v2089_v41 = vrot.slane %v2082_v36, 1  ;;  %v2101_v43 = vrot.slane %v2080_v35, 2 }
 0x52c   : > { %v3737_v9 = vpack.i.bf16 %v2054_v32, %v2051_v39  ;;  %v2102_v44 = vrot.slane %v2082_v36, 2  ;;  %v2064_v47 = vsel %vm1364_vm10, %v2062_v33, %v2063_v37 }
 0x52d   : > { %v2090_v45 = vsel %vm1366_vm11, %v2088_v40, %v2089_v41 }
 0x52e   : > { %3738 = vrot.lane.b32.xlu0 %v3737_v9, %s4843_s25  ;;  %v3742_v46 = vpack.i.bf16 %v2093_v42, %v2090_v45  ;;  %v2103_v48 = vsel %vm1364_vm10, %v2101_v43, %v2102_v44  ;;  %v3887_v45 = vld [vmem:[%s4814_s14 + $0x58] sm:$0xff]  }
 0x52f   : > { %v2113_v49 = vpack.c.bf16 %v2103_v48, %v2064_v47 }
 0x530   : > { %3743 = vrot.lane.b32.xlu1 %v3742_v46, %s4843_s25 }
 0x531   : > { %2486 = vmatprep.mubr.bf16.mxu1 %v2113_v49 }
 0x5a0   : > { %v3739_v57 = vpop.permute.xlu0 %3738 }
 0x5a1   : > { %v3741_v58 = vunpack.i.h.bf16 %v3739_v57  ;;  %v3740_v59 = vunpack.i.l.bf16 %v3739_v57 }
 0x5a2   : > { %v3744_v60 = vpop.permute.xlu1 %3743 }
 0x5a3   : > { %v3746_v61 = vunpack.i.h.bf16 %v3744_v60  ;;  %v3745_v62 = vunpack.i.l.bf16 %v3744_v60  ;;  %v2059_v63 = vsel %vm865_vm7, %v3740_v59, %v3741_v58  ;;  %v2070_v1 = vsel %vm865_vm7, %v4530_v7, %v3740_v59  ;;  %v3874_v7 = vld [vmem:[%s4812_s12 + $0x110] sm:$0xff]  }
 0x5a5   : > { %v2098_v0 = vsel %vm865_vm7, %v3745_v62, %v3746_v61  ;;  %v2109_v2 = vsel %vm865_vm7, %v2081_v15, %v3745_v62  ;;  %v3882_v15 = vld [vmem:[%s4814_s14 + $0x30] sm:$0xff]  }
 0x5a6   : > { %v2112_v4 = vpack.c.bf16 %v2098_v0, %v2059_v63  ;;  %v2111_v5 = vpack.c.bf16 %v2109_v2, %v2070_v1 }
 0x5a8   : > { %2445 = vmatprep.mubr.bf16.mxu0 %v2111_v5  ;;  %2487 = vmatmul.mubr.bf16.vlgmr.msra.gmra.mrb[16].mxu1 %v2112_v4 }
 0x5a9   : > { %3701 = vmatpush3.bf16.msra.mxu1 %v3872_v3  ;;  %3463 = vmatmul.mubr.msk.bf16.vlgmr.msra.gmra.mrb[12].mxu0 %vm4341_vm13, %v3462_v34 }
 0x5aa   : > { %3702 = vmatprep.subr.bf16.mxu1 %v3921_v38  ;;  %3708 = vmatprep.mubr.msk.bf16.mxu1 %vm3922_vm5, %v3921_v38 }
 0x5ab   : > { %2683 = vmatpush1.bf16.msra.mxu0 %v3876_v8  ;;  %v3888_v8 = vld [vmem:[%s4816_s16] sm:$0xff]  }
 0x5ac   : > { %2684 = vmatprep.subr.bf16.mxu0 %v3925_v12 }
 0x5ad   : > { %3703 = vmatpush3.bf16.msra.mxu1 %v3873_v6 }
 0x5ae   : > { %3704 = vmatprep.subr.bf16.mxu1 %v3921_v38 }
 0x5af   : > { %2685 = vmatpush1.bf16.msra.mxu0 %v3877_v10  ;;  %v3889_v10 = vld [vmem:[%s4816_s16 + $0x8] sm:$0xff]  }
 0x5b0   : > { %2686 = vmatprep.subr.bf16.mxu0 %v3925_v12 }
 0x5b1   : > { %3705 = vmatpush3.bf16.msra.mxu1 %v3874_v7 }
 0x5b2   : > { %3706 = vmatprep.subr.bf16.mxu1 %v3921_v38  ;;  %v3878_v38 = vld [vmem:[%s4814_s14 + $0x10] sm:$0xff]  }
 0x5b3   : > { %2687 = vmatpush1.bf16.msra.mxu0 %v3878_v38  ;;  %v3890_v38 = vld [vmem:[%s4816_s16 + $0x10] sm:$0xff]  }
 0x5b4   : > { %2688 = vmatprep.subr.bf16.mxu0 %v3925_v12 }
 0x5b5   : > { %3707 = vmatpush3.bf16.msra.mxu1 %v3875_v21 }
 0x5b6   : > { %2875 = vmatprep.subr.bf16.mxu1 %v3925_v12 }
 0x5b7   : > { %2689 = vmatpush1.bf16.msra.mxu0 %v3879_v11  ;;  %v3891_v11 = vld [vmem:[%s4816_s16 + $0x18] sm:$0xff]  }
 0x5b8   : > { %3709 = vmatmul.mubr.msk.bf16.vlgmr.msra.gmra.mrb[20].mxu1 %vm865_vm7, %v2114_v56  ;;  %2690 = vmatprep.subr.bf16.mxu0 %v3925_v12 }
 0x5b9   : > { %2876 = vmatpush1.bf16.msra.mxu1 %v3888_v8 }
 0x5ba   : > { %2877 = vmatprep.subr.bf16.mxu1 %v3925_v12 }
 0x5bb   : > { %2691 = vmatpush1.bf16.msra.mxu0 %v3880_v13  ;;  %v3892_v13 = vld [vmem:[%s4816_s16 + $0x20] sm:$0xff]  }
 0x5bc   : > { %2692 = vmatprep.subr.bf16.mxu0 %v3925_v12 }
 0x5bd   : > { %2878 = vmatpush1.bf16.msra.mxu1 %v3889_v10 }
 0x5be   : > { %2879 = vmatprep.subr.bf16.mxu1 %v3925_v12 }
 0x5bf   : > { %2693 = vmatpush1.bf16.msra.mxu0 %v3881_v14  ;;  %v3893_v14 = vld [vmem:[%s4816_s16 + $0x28] sm:$0xff]  }
 0x5c0   : > { %2694 = vmatprep.subr.bf16.mxu0 %v3925_v12 }
 0x5c1   : > { %2880 = vmatpush1.bf16.msra.mxu1 %v3890_v38 }
 0x5c2   : > { %2881 = vmatprep.subr.bf16.mxu1 %v3925_v12 }
 0x5c3   : > { %2695 = vmatpush1.bf16.msra.mxu0 %v3882_v15  ;;  %v3894_v15 = vld [vmem:[%s4816_s16 + $0x30] sm:$0xff]  }
 0x5c4   : > { %2696 = vmatprep.subr.bf16.mxu0 %v3925_v12 }
 0x5c5   : > { %2882 = vmatpush1.bf16.msra.mxu1 %v3891_v11 }
 0x5c6   : > { %2883 = vmatprep.subr.bf16.mxu1 %v3925_v12 }
 0x5c7   : > { %2697 = vmatpush1.bf16.msra.mxu0 %v3883_v16  ;;  %v3895_v16 = vld [vmem:[%s4816_s16 + $0x38] sm:$0xff]  }
 0x5c8   : > { %2698 = vmatprep.subr.bf16.mxu0 %v3925_v12 }
 0x5c9   : > { %2884 = vmatpush1.bf16.msra.mxu1 %v3892_v13 }
 0x5ca   : > { %2885 = vmatprep.subr.bf16.mxu1 %v3925_v12 }
 0x5cb   : > { %2699 = vmatpush1.bf16.msra.mxu0 %v3884_v17  ;;  %v3896_v17 = vld [vmem:[%s4816_s16 + $0x40] sm:$0xff]  }
 0x5cc   : > { %2700 = vmatprep.subr.bf16.mxu0 %v3925_v12 }
 0x5cd   : > { %2886 = vmatpush1.bf16.msra.mxu1 %v3893_v14  ;;  %v3911_v14 = vld [vmem:[%s4818_s18 + $0x58] sm:$0xff]  }
 0x5ce   : > { %2887 = vmatprep.subr.bf16.mxu1 %v3925_v12 }
 0x5cf   : > { %2701 = vmatpush1.bf16.msra.mxu0 %v3885_v18  ;;  %v3897_v18 = vld [vmem:[%s4816_s16 + $0x48] sm:$0xff]  }
 0x5d0   : > { %2702 = vmatprep.subr.bf16.mxu0 %v3925_v12 }
 0x5d1   : > { %2888 = vmatpush1.bf16.msra.mxu1 %v3894_v15 }
 0x5d2   : > { %2889 = vmatprep.subr.bf16.mxu1 %v3925_v12 }
 0x5d3   : > { %2703 = vmatpush1.bf16.msra.mxu0 %v3886_v19  ;;  %v3898_v19 = vld [vmem:[%s4816_s16 + $0x50] sm:$0xff]  }
 0x5d4   : > { %2704 = vmatprep.subr.bf16.mxu0 %v3925_v12 }
 0x5d5   : > { %2890 = vmatpush1.bf16.msra.mxu1 %v3895_v16 }
 0x5d6   : > { %2891 = vmatprep.subr.bf16.mxu1 %v3925_v12 }
 0x5d7   : > { %2705 = vmatpush1.bf16.msra.mxu0 %v3887_v45 }
 0x5d8   : > { %3062 = vmatprep.subr.bf16.mxu0 %v3925_v12 }
 0x5d9   : > { %2892 = vmatpush1.bf16.msra.mxu1 %v3896_v17 }
 0x5da   : > { %2893 = vmatprep.subr.bf16.mxu1 %v3925_v12 }
 0x5dd   : > { %2894 = vmatpush1.bf16.msra.mxu1 %v3897_v18 }
 0x5de   : > { %2895 = vmatprep.subr.bf16.mxu1 %v3925_v12 }
 0x5e1   : > { %2896 = vmatpush1.bf16.msra.mxu1 %v3898_v19 }
 0x5e2   : > { %2897 = vmatprep.subr.bf16.mxu1 %v3925_v12 }
 0x67b   : > { %v3641_v20 = vpop.f32.mrb[16].mxu1 }
 0x67c   : > { %v3619_v22 = vpop.f32.mrb[12].mxu0  ;;  %v3642_v23 = vpop.f32.mrb[17].mxu1 }
 0x67d   : > { %v3643_v24 = vadd.f32 %v3642_v23, %v3641_v20  ;;  %v3620_v26 = vpop.f32.mrb[13].mxu0  ;;  %v3644_v27 = vpop.f32.mrb[18].mxu1  ;;  %v3465_v20 = vld [vmem:[%s4815_s15] ss:$0 sm:$0xff] }
 0x67e   : > { %v3621_v28 = vadd.f32 %v3620_v26, %v3619_v22  ;;  %v3622_v29 = vpop.f32.mrb[14].mxu0  ;;  %v3645_v30 = vpop.f32.mrb[19].mxu1 }
 0x67f   : > { %v3646_v31 = vadd.f32 %v3645_v30, %v3644_v27  ;;  %v3623_v32 = vpop.f32.mrb[15].mxu0 }
 0x680   : > { %v2448_v33 = vadd.f32 %v3621_v28, %v3422_v25  ;;  %v3624_v34 = vadd.f32 %v3623_v32, %v3622_v29  ;;  %v3899_v29 = vld [vmem:[%s4816_s16 + $0x58] sm:$0xff]  }
 0x681   : > { %2898 = vmatpush1.bf16.msra.mxu1 %v3899_v29 }
 0x682   : > { %v2451_v35 = vadd.f32 %v3624_v34, %v3422_v25  ;;  %v2489_v36 = vadd.f32 %v3643_v24, %v2448_v33 }
 0x684   : > { %v2492_v37 = vadd.f32 %v3646_v31, %v2451_v35 }
 0x68b   : > { %v2529_v39 = vpop.f32.mrb[20].mxu1 }
 0x68c   : > { %v2530_v40 = vadd.f32 %v2529_v39, %v2489_v36  ;;  %v3710_v41 = vpop.f32.mrb[21].mxu1 }
 0x68d   : > { %v2532_v42 = vpop.f32.mrb[22].mxu1 }
 0x68e   : > { %v2536_v9 = vmax.f32 %v2530_v40, 0.0  ;;  %v2533_v43 = vadd.f32 %v2532_v42, %v2492_v37  ;;  %v3711_v44 = vpop.f32.mrb[23].mxu1 }
 0x690   : > { %v2539_v46 = vrot.slane %v2536_v9, 7  ;;  %v2537_v47 = vmax.f32 %v2533_v43, 0.0 }
 0x692   : > { %v2541_v48 = vsel %vm834_vm0, 0.0, %v2539_v46  ;;  %v2542_v49 = vsel %vm834_vm0, %v2539_v46, 0.0  ;;  %v2557_v50 = vrot.slane %v2537_v47, 7 }
 0x693   : > { %v2545_v51 = vrot.slane %v2541_v48, 1  ;;  %v2546_v52 = vrot.slane %v2542_v49, 1  ;;  %v2551_v53 = vrot.slane %v2541_v48, 2  ;;  %v2552_v54 = vrot.slane %v2542_v49, 2 }
 0x694   : > { %v2559_v55 = vsel %vm834_vm0, 0.0, %v2557_v50  ;;  %v2560_v56 = vsel %vm834_vm0, %v2557_v50, 0.0 }
 0x695   : > { %v2563_v57 = vrot.slane %v2559_v55, 1  ;;  %v2564_v58 = vrot.slane %v2560_v56, 1  ;;  %v2569_v59 = vrot.slane %v2559_v55, 2  ;;  %v2570_v60 = vrot.slane %v2560_v56, 2 }
 0x696   : > { %v2553_v61 = vsel %vm1364_vm10, %v2551_v53, %v2552_v54  ;;  %v2547_v63 = vsel %vm1366_vm11, %v2545_v51, %v2546_v52 }
 0x697   : > { %v2571_v62 = vsel %vm1364_vm10, %v2569_v59, %v2570_v60  ;;  %v2565_v0 = vsel %vm1366_vm11, %v2563_v57, %v2564_v58  ;;  %v3900_v59 = vld [vmem:[%s4818_s18] sm:$0xff]   ;;  %v3901_v60 = vld [vmem:[%s4818_s18 + $0x8] sm:$0xff]  }
 0x698   : > { %v2575_v1 = vpack.c.bf16 %v2571_v62, %v2553_v61  ;;  %v3747_v2 = vpack.i.bf16 %v2565_v0, %v2547_v63  ;;  %v3902_v61 = vld [vmem:[%s4818_s18 + $0x10] sm:$0xff]   ;;  %v3903_v62 = vld [vmem:[%s4818_s18 + $0x18] sm:$0xff]   ;;  %v3904_v63 = vld [vmem:[%s4818_s18 + $0x20] sm:$0xff]  }
 0x699   : > { %v3905_v0 = vld [vmem:[%s4818_s18 + $0x28] sm:$0xff]  }
 0x69a   : > { %3478 = vmatprep.mubr.msk.bf16.mxu0 %vm865_vm7, %v2575_v1  ;;  %3748 = vrot.lane.b32.xlu0 %v3747_v2, %s4843_s25  ;;  %v3906_v1 = vld [vmem:[%s4818_s18 + $0x30] sm:$0xff]   ;;  %v3907_v2 = vld [vmem:[%s4818_s18 + $0x38] sm:$0xff]  }
 0x70c   : > { %v3749_v3 = vpop.permute.xlu0 %3748 }
 0x70d   : > { %v3751_v4 = vunpack.i.h.bf16 %v3749_v3  ;;  %v3750_v5 = vunpack.i.l.bf16 %v3749_v3  ;;  %v3908_v3 = vld [vmem:[%s4818_s18 + $0x40] sm:$0xff]  }
 0x70f   : > { %v2573_v6 = vsel %vm865_vm7, %v2559_v55, %v3751_v4  ;;  %v2555_v7 = vsel %vm865_vm7, %v2541_v48, %v3750_v5  ;;  %v3909_v4 = vld [vmem:[%s4818_s18 + $0x48] sm:$0xff]   ;;  %v3910_v5 = vld [vmem:[%s4818_s18 + $0x50] sm:$0xff]  }
 0x710   : > { %v2574_v21 = vpack.c.bf16 %v2573_v6, %v2555_v7  ;;  %v3480_v6 = vld [vmem:[%s4817_s17] ss:$0 sm:$0xff] }
 0x712   : > { %2715 = vmatmul.mubr.bf16.vlgmr.msra.gmra.mrb[16].mxu0 %v2574_v21 }
 0x713   : > { %3063 = vmatpush1.bf16.msra.mxu0 %v3900_v59 }
 0x714   : > { %3064 = vmatprep.subr.bf16.mxu0 %v3925_v12 }
 0x717   : > { %3065 = vmatpush1.bf16.msra.mxu0 %v3901_v60 }
 0x718   : > { %3066 = vmatprep.subr.bf16.mxu0 %v3925_v12 }
 0x71b   : > { %3067 = vmatpush1.bf16.msra.mxu0 %v3902_v61 }
 0x71c   : > { %3068 = vmatprep.subr.bf16.mxu0 %v3925_v12 }
 0x71f   : > { %3069 = vmatpush1.bf16.msra.mxu0 %v3903_v62 }
 0x720   : > { %3070 = vmatprep.subr.bf16.mxu0 %v3925_v12 }
 0x723   : > { %3071 = vmatpush1.bf16.msra.mxu0 %v3904_v63 }
 0x724   : > { %3072 = vmatprep.subr.bf16.mxu0 %v3925_v12 }
 0x727   : > { %3073 = vmatpush1.bf16.msra.mxu0 %v3905_v0 }
 0x728   : > { %3074 = vmatprep.subr.bf16.mxu0 %v3925_v12 }
 0x72b   : > { %3075 = vmatpush1.bf16.msra.mxu0 %v3906_v1 }
 0x72c   : > { %3076 = vmatprep.subr.bf16.mxu0 %v3925_v12 }
 0x72f   : > { %3077 = vmatpush1.bf16.msra.mxu0 %v3907_v2 }
 0x730   : > { %3078 = vmatprep.subr.bf16.mxu0 %v3925_v12 }
 0x733   : > { %3079 = vmatpush1.bf16.msra.mxu0 %v3908_v3 }
 0x734   : > { %3080 = vmatprep.subr.bf16.mxu0 %v3925_v12 }
 0x737   : > { %3081 = vmatpush1.bf16.msra.mxu0 %v3909_v4 }
 0x738   : > { %3082 = vmatprep.subr.bf16.mxu0 %v3925_v12 }
 0x73b   : > { %3083 = vmatpush1.bf16.msra.mxu0 %v3910_v5 }
 0x73c   : > { %3084 = vmatprep.subr.bf16.mxu0 %v3925_v12 }
 0x73f   : > { %3085 = vmatpush1.bf16.msra.mxu0 %v3911_v14 }
 0x7e5   : > { %v2716_v22 = vpop.f32.mrb[16].mxu0 }
 0x7e6   : > { %v2717_v23 = vadd.f32 %v3465_v20, %v2716_v22  ;;  %v2718_v24 = vpop.f32.mrb[17].mxu0 }
 0x7e7   : > { %v2719_v25 = vpop.f32.mrb[18].mxu0 }
 0x7e8   : > { %v2723_v26 = vmax.f32 %v2717_v23, 0.0  ;;  %v2720_v27 = vadd.f32 %v3465_v20, %v2719_v25  ;;  %v2721_v28 = vpop.f32.mrb[19].mxu0 }
 0x7ea   : > { %v2725_v30 = vpack.c.bf16 %v2723_v26, %v2723_v26  ;;  %v2732_v31 = vrot.slane %v2723_v26, 7  ;;  %v2724_v32 = vmax.f32 %v2720_v27, 0.0 }
 0x7ec   : > { %2727 = vst.msk [vmem:[%s809_s26] sm:$0xf] %vm2726_vm14, %v2725_v30  ;;  %v2734_v33 = vsel %vm834_vm0, 0.0, %v2732_v31  ;;  %v2735_v34 = vsel %vm834_vm0, %v2732_v31, 0.0  ;;  %v2728_v35 = vpack.c.bf16 %v2724_v32, %v2724_v32  ;;  %v2750_v36 = vrot.slane %v2724_v32, 7 }
 0x7ed   : > { %v2738_v37 = vrot.slane %v2734_v33, 1  ;;  %v2739_v39 = vrot.slane %v2735_v34, 1  ;;  %v2744_v40 = vrot.slane %v2734_v33, 2  ;;  %v2745_v41 = vrot.slane %v2735_v34, 2 }
 0x7ee   : > { %3479 = vst.msk [vmem:[%s809_s26 + $0x4] sm:$0xf] %vm2726_vm14, %v2728_v35  ;;  %v2752_v42 = vsel %vm834_vm0, 0.0, %v2750_v36  ;;  %v2753_v9 = vsel %vm834_vm0, %v2750_v36, 0.0  ;;  %s815_s26 = scalar_lea.vmem %s4823_s23, %s4201_s2 }
 0x7ef   : > { %v2756_v43 = vrot.slane %v2752_v42, 1  ;;  %v2757_v44 = vrot.slane %v2753_v9, 1  ;;  %v2762_v45 = vrot.slane %v2752_v42, 2  ;;  %v2763_v46 = vrot.slane %v2753_v9, 2  ;;  %v3494_v9 = vld [vmem:[%s4819_s19] ss:$0 sm:$0xff] }
 0x7f0   : > { %v2746_v47 = vsel %vm1364_vm10, %v2744_v40, %v2745_v41  ;;  %v2740_v49 = vsel %vm1366_vm11, %v2738_v37, %v2739_v39 }
 0x7f1   : > { %v2764_v48 = vsel %vm1364_vm10, %v2762_v45, %v2763_v46  ;;  %v2758_v50 = vsel %vm1366_vm11, %v2756_v43, %v2757_v44 }
 0x7f2   : > { %v2768_v51 = vpack.c.bf16 %v2764_v48, %v2746_v47  ;;  %v3752_v52 = vpack.i.bf16 %v2758_v50, %v2740_v49 }
 0x7f4   : > { %3493 = vmatprep.mubr.msk.bf16.mxu1 %vm865_vm7, %v2768_v51  ;;  %3753 = vrot.lane.b32.xlu1 %v3752_v52, %s4843_s25 }
 0x866   : > { %v3754_v53 = vpop.permute.xlu1 %3753 }
 0x867   : > { %v3756_v54 = vunpack.i.h.bf16 %v3754_v53  ;;  %v3755_v55 = vunpack.i.l.bf16 %v3754_v53 }
 0x869   : > { %v2766_v56 = vsel %vm865_vm7, %v2752_v42, %v3756_v54  ;;  %v2748_v57 = vsel %vm865_vm7, %v2734_v33, %v3755_v55 }
 0x86a   : > { %v2767_v58 = vpack.c.bf16 %v2766_v56, %v2748_v57 }
 0x86c   : > { %2908 = vmatmul.mubr.bf16.vlgmr.msra.gmra.mrb[24].mxu1 %v2767_v58 }
 0x93f   : > { %v2909_v7 = vpop.f32.mrb[24].mxu1 }
 0x940   : > { %v2910_v21 = vadd.f32 %v3480_v6, %v2909_v7  ;;  %v2911_v8 = vpop.f32.mrb[25].mxu1 }
 0x941   : > { %v2912_v10 = vpop.f32.mrb[26].mxu1 }
 0x942   : > { %v2916_v38 = vmax.f32 %v2910_v21, 0.0  ;;  %v2913_v11 = vadd.f32 %v3480_v6, %v2912_v10  ;;  %v2914_v13 = vpop.f32.mrb[27].mxu1 }
 0x944   : > { %v2919_v15 = vrot.slane %v2916_v38, 7  ;;  %v2917_v16 = vmax.f32 %v2913_v11, 0.0 }
 0x946   : > { %v2921_v12 = vsel %vm834_vm0, 0.0, %v2919_v15  ;;  %v2922_v17 = vsel %vm834_vm0, %v2919_v15, 0.0  ;;  %v2937_v18 = vrot.slane %v2917_v16, 7 }
 0x947   : > { %v2925_v19 = vrot.slane %v2921_v12, 1  ;;  %v2926_v20 = vrot.slane %v2922_v17, 1  ;;  %v2931_v22 = vrot.slane %v2921_v12, 2  ;;  %v2932_v23 = vrot.slane %v2922_v17, 2 }
 0x948   : > { %v2939_v24 = vsel %vm834_vm0, 0.0, %v2937_v18  ;;  %v2940_v25 = vsel %vm834_vm0, %v2937_v18, 0.0 }
 0x949   : > { %v2943_v26 = vrot.slane %v2939_v24, 1  ;;  %v2944_v27 = vrot.slane %v2940_v25, 1  ;;  %v2949_v28 = vrot.slane %v2939_v24, 2  ;;  %v2950_v29 = vrot.slane %v2940_v25, 2 }
 0x94a   : > { %v2933_v30 = vsel %vm1364_vm10, %v2931_v22, %v2932_v23  ;;  %v2927_v32 = vsel %vm1366_vm11, %v2925_v19, %v2926_v20 }
 0x94b   : > { %v2951_v31 = vsel %vm1364_vm10, %v2949_v28, %v2950_v29  ;;  %v2945_v33 = vsel %vm1366_vm11, %v2943_v26, %v2944_v27 }
 0x94c   : > { %v2955_v34 = vpack.c.bf16 %v2951_v31, %v2933_v30  ;;  %v3757_v35 = vpack.i.bf16 %v2945_v33, %v2927_v32 }
 0x94e   : > { %3507 = vmatprep.mubr.msk.bf16.mxu0 %vm865_vm7, %v2955_v34  ;;  %3758 = vrot.lane.b32.xlu0 %v3757_v35, %s4843_s25 }
 0x9c0   : > { %v3759_v36 = vpop.permute.xlu0 %3758 }
 0x9c1   : > { %v3761_v37 = vunpack.i.h.bf16 %v3759_v36  ;;  %v3760_v39 = vunpack.i.l.bf16 %v3759_v36 }
 0x9c3   : > { %v2953_v40 = vsel %vm865_vm7, %v2939_v24, %v3761_v37  ;;  %v2935_v41 = vsel %vm865_vm7, %v2921_v12, %v3760_v39 }
 0x9c4   : > { %v2954_v42 = vpack.c.bf16 %v2953_v40, %v2935_v41 }
 0x9c6   : > { %3095 = vmatmul.mubr.bf16.vlgmr.msra.gmra.mrb[20].mxu0 %v2954_v42 }
 0xa99   : > { %v3096_v43 = vpop.f32.mrb[20].mxu0 }
 0xa9a   : > { %v3097_v44 = vadd.f32 %v3494_v9, %v3096_v43  ;;  %v3098_v45 = vpop.f32.mrb[21].mxu0 }
 0xa9b   : > { %v3099_v46 = vpop.f32.mrb[22].mxu0 }
 0xa9c   : > { %v3103_v47 = vmax.f32 %v3097_v44, 0.0  ;;  %v3100_v48 = vadd.f32 %v3494_v9, %v3099_v46  ;;  %v3101_v49 = vpop.f32.mrb[23].mxu0 }
 0xa9e   : > { %v3105_v50 = vpack.c.bf16 %v3103_v47, %v3103_v47  ;;  %v3104_v51 = vmax.f32 %v3100_v48, 0.0 }
 0xaa0   : > { %3106 = vst.msk [vmem:[%s815_s26] sm:$0xf] %vm2726_vm14, %v3105_v50  ;;  %v3107_v52 = vpack.c.bf16 %v3104_v51, %v3104_v51 }
 0xaa2   : > { %3508 = vst.msk [vmem:[%s815_s26 + $0x4] sm:$0xf] %vm2726_vm14, %v3107_v52 }
 0xaa3 PF: > { %s34_s4 = sadd.s32 1, %s3918_s4  }
 0xaa4   : > { %p31_p4 = scmp.ge.s32.totalorder %s34_s4, 4  }
 0xaa6   :  { %33 = sbr.rel (!%p31_p4) target bundleno = 9 (0x9), region = 183 }

</bundles_post_ra>
